<compile_context>
chip_gen: v7x
topology: tpu7x:2x2x1
jax: 0.10.0
libtpu: 0.0.40
codegen_flags: <defaults>
</compile_context>

<pallas_src>
import math

import jax
import jax.numpy as jnp
from jax.experimental import pallas as pl
from jax.experimental.pallas import tpu as pltpu

d_k = d_v = 64
_SCALE = 1.0 / math.sqrt(d_k)
_MASK_VALUE = -1e9    # module's masked_fill constant
_PAD_BIAS = -1e30     # bias for padded key positions (never receive weight)
_NEG_INIT = -1e30     # finite init for the running max


def _flash_sdpa_kernel(q_ref, k_ref, v_ref, b_ref, o_ref, m_sc, l_sc, acc_sc):
    # q_ref: (G, tq, dk) bf16   k_ref/v_ref: (G, tk, d) bf16
    # b_ref: (G, tq, tk) or (G, 1, tk) bf16 additive bias
    # o_ref: (G, tq, dv)        scratch: m/l (G, tq, 1) f32, acc (G, tq, dv) f32
    kv = pl.program_id(2)

    @pl.when(kv == 0)
    def _init():
        m_sc[...] = jnp.full(m_sc.shape, _NEG_INIT, m_sc.dtype)
        l_sc[...] = jnp.zeros(l_sc.shape, l_sc.dtype)
        acc_sc[...] = jnp.zeros(acc_sc.shape, acc_sc.dtype)

    # scores = (Q * 1/sqrt(d_k)) @ K^T  -- bf16 MXU inputs, f32 accumulation.
    s = jnp.einsum("gqd,gkd->gqk", q_ref[...], k_ref[...],
                   preferred_element_type=jnp.float32)
    # masked_fill -> single additive bias (0 visible, -1e9 masked, -1e30 padded keys).
    # (G,1,tk) biases broadcast over the query tile for key-padding masks.
    s = s + b_ref[...].astype(jnp.float32)

    # Online softmax update.
    m_prev = m_sc[...]
    m_new = jnp.maximum(m_prev, s.max(axis=-1, keepdims=True))
    alpha = jnp.exp(m_prev - m_new)
    p = jnp.exp(s - m_new)
    l_sc[...] = alpha * l_sc[...] + p.sum(axis=-1, keepdims=True)
    acc_sc[...] = alpha * acc_sc[...] + jnp.einsum(
        "gqk,gkd->gqd", p.astype(v_ref.dtype), v_ref[...],
        preferred_element_type=jnp.float32)
    m_sc[...] = m_new

    @pl.when(kv == pl.num_programs(2) - 1)
    def _finalize():
        # Exact divide (once per (g, q-tile) -> negligible cost, full accuracy).
        o_ref[...] = (acc_sc[...] / l_sc[...]).astype(o_ref.dtype)


def _choose_tile(S):
    return 256 if S % 256 == 0 else 128


def _choose_group(bh, n_q_tiles, max_g=8):
    divisors = [g for g in range(min(bh, max_g), 0, -1) if bh % g == 0]
    for g in divisors:
        if (bh // g) * n_q_tiles >= 2:   # keep >=2 parallel programs for v7x's 2 TCs
            return g
    return divisors[0]


def scale_dot_product_attention(Q, K, V, attn_mask):
    """Q, K: [B,H,S,d_k]; V: [B,H,S,d_v]; attn_mask broadcastable to [B,H,S,S]
    (truthy entries are masked, matching torch masked_fill_(attn_mask, -1e9))."""
    B, H, S, dk = Q.shape
    dv = V.shape[-1]
    BH = B * H
    out_dtype = Q.dtype

    tq = tk = _choose_tile(S)
    S_pad = ((S + tq - 1) // tq) * tq
    n_q_tiles = S_pad // tq
    G = _choose_group(BH, n_q_tiles)

    # Fold 1/sqrt(d_k) into Q once (exact: power of two), cast to bf16 for the MXU.
    q = (Q.reshape(BH, S, dk) * _SCALE).astype(jnp.bfloat16)
    k = K.reshape(BH, S, dk).astype(jnp.bfloat16)
    v = V.reshape(BH, S, dv).astype(jnp.bfloat16)

    # Mask -> additive bf16 bias.  Query-invariant masks ([..., 1, S]) stay [BH, 1, S]
    # so the S^2 mask stream disappears; general masks stream a dense bf16 bias.
    am = jnp.asarray(attn_mask)
    if am.ndim < 4:
        am = am.reshape((1,) * (4 - am.ndim) + am.shape)
    q_bcast = am.shape[2] == 1
    mq = 1 if q_bcast else S
    am = jnp.broadcast_to(am.astype(bool), (B, H, mq, S)).reshape(BH, mq, S)
    bias = jnp.where(am, _MASK_VALUE, 0.0).astype(jnp.bfloat16)

    # Pad ragged S up to a tile multiple: padded keys get a -1e30 bias (zero softmax
    # weight); padded query rows are sliced off the output.
    if S_pad != S:
        pad = S_pad - S
        q = jnp.pad(q, ((0, 0), (0, pad), (0, 0)))
        k = jnp.pad(k, ((0, 0), (0, pad), (0, 0)))
        v = jnp.pad(v, ((0, 0), (0, pad), (0, 0)))
        bias = jnp.pad(bias, ((0, 0), (0, 0), (0, pad)), constant_values=_PAD_BIAS)
        if not q_bcast:
            bias = jnp.pad(bias, ((0, 0), (0, pad), (0, 0)))
    bq = 1 if q_bcast else tq

    grid = (BH // G, n_q_tiles, S_pad // tk)

    out = pl.pallas_call(
        _flash_sdpa_kernel,
        out_shape=jax.ShapeDtypeStruct((BH, S_pad, dv), out_dtype),
        grid_spec=pltpu.PrefetchScalarGridSpec(
            num_scalar_prefetch=0,
            grid=grid,
            in_specs=[
                pl.BlockSpec((G, tq, dk), lambda g, qi, ki: (g, qi, 0)),
                pl.BlockSpec((G, tk, dk), lambda g, qi, ki: (g, ki, 0)),
                pl.BlockSpec((G, tk, dv), lambda g, qi, ki: (g, ki, 0)),
                pl.BlockSpec((G, bq, tk),
                             (lambda g, qi, ki: (g, 0, ki)) if q_bcast
                             else (lambda g, qi, ki: (g, qi, ki))),
            ],
            out_specs=pl.BlockSpec((G, tq, dv), lambda g, qi, ki: (g, qi, 0)),
            scratch_shapes=[
                pltpu.VMEM((G, tq, 1), jnp.float32),    # running max
                pltpu.VMEM((G, tq, 1), jnp.float32),    # running denominator
                pltpu.VMEM((G, tq, dv), jnp.float32),   # output accumulator
            ],
        ),
        compiler_params=pltpu.CompilerParams(
            dimension_semantics=("parallel", "parallel", "arbitrary"),
            vmem_limit_bytes=32 * 1024 * 1024,
        ),
    )(q, k, v, bias)

    if S_pad != S:
        out = out[:, :S, :]
    return out.reshape(B, H, S, dv)


def _reference(Q, K, V, attn_mask):
    scores = jnp.einsum("bhqd,bhkd->bhqk", Q, K) / math.sqrt(d_k)
    scores = jnp.where(attn_mask, jnp.float32(_MASK_VALUE), scores)
    attn = jax.nn.softmax(scores, axis=-1)
    return jnp.einsum("bhqk,bhkd->bhqd", attn, V)


if __name__ == "__main__":
    # bf16 matmul inputs (intended design) -> ~1e-2-level agreement with the f32
    # reference; structural bugs would show errors >> 1e-1, so 2e-2 still catches them.
    ATOL = RTOL = 2e-2
    root = jax.random.PRNGKey(0)

    # ---- case 1: tiny seq (module-style), dense key-padding mask ------------------
    B, H, S = 2, 2, 8
    k1, k2, k3, root = jax.random.split(root, 4)
    Q = jax.random.normal(k1, (B, H, S, d_k), jnp.float32)
    K = jax.random.normal(k2, (B, H, S, d_k), jnp.float32)
    V = jax.random.normal(k3, (B, H, S, d_v), jnp.float32)
    pad_keys = jnp.arange(S) >= S - 2                       # last 2 keys masked
    mask = jnp.broadcast_to(pad_keys[None, None, None, :], (B, H, S, S))
    out = jax.block_until_ready(scale_dot_product_attention(Q, K, V, mask))
    ref = _reference(Q, K, V, mask)
    assert out.shape == (B, H, S, d_v)
    assert jnp.allclose(out, ref, atol=ATOL, rtol=RTOL), "mismatch (case 1)"

    # ---- case 2: multi-tile dense (causal) mask ------------------------------------
    B, H, S = 1, 2, 384
    k1, k2, k3, root = jax.random.split(root, 4)
    Q = jax.random.normal(k1, (B, H, S, d_k), jnp.float32)
    K = jax.random.normal(k2, (B, H, S, d_k), jnp.float32)
    V = jax.random.normal(k3, (B, H, S, d_v), jnp.float32)
    causal = jnp.triu(jnp.ones((S, S), dtype=bool), k=1)
    mask = jnp.broadcast_to(causal[None, None], (B, H, S, S))
    out = jax.block_until_ready(scale_dot_product_attention(Q, K, V, mask))
    ref = _reference(Q, K, V, mask)
    assert jnp.allclose(out, ref, atol=ATOL, rtol=RTOL), "mismatch (case 2)"

    # ---- case 3: ragged S + query-broadcast key-padding mask (fast path) -----------
    B, H, S = 1, 2, 300
    k1, k2, k3, root = jax.random.split(root, 4)
    Q = jax.random.normal(k1, (B, H, S, d_k), jnp.float32)
    K = jax.random.normal(k2, (B, H, S, d_k), jnp.float32)
    V = jax.random.normal(k3, (B, H, S, d_v), jnp.float32)
    lens = jnp.array([260, 300])                            # per-head valid key lengths
    keymask = jnp.arange(S)[None, :] >= lens[:, None]       # (H, S)
    mask = keymask[None, :, None, :]                        # (B, H, 1, S) broadcast mask
    out = jax.block_until_ready(scale_dot_product_attention(Q, K, V, mask))
    ref = _reference(Q, K, V, mask)
    assert jnp.allclose(out, ref, atol=ATOL, rtol=RTOL), "mismatch (case 3)"

    print("KERNEL_OK")
</pallas_src>

<mosaic_0001>
module attributes {stable_mosaic.version = 11 : i64} {
  func.func @_flash_sdpa_kernel(%arg0: i32, %arg1: i32, %arg2: i32, %arg3: memref<2x128x64xbf16, #tpu.memory_space<vmem>>, %arg4: memref<2x128x64xbf16, #tpu.memory_space<vmem>>, %arg5: memref<2x128x64xbf16, #tpu.memory_space<vmem>>, %arg6: memref<2x128x128xbf16, #tpu.memory_space<vmem>>, %arg7: memref<2x128x64xf32, #tpu.memory_space<vmem>>, %arg8: memref<2x128x1xf32, #tpu.memory_space<vmem>>, %arg9: memref<2x128x1xf32, #tpu.memory_space<vmem>>, %arg10: memref<2x128x64xf32, #tpu.memory_space<vmem>>) attributes {dimension_semantics = [#tpu.dimension_semantics<parallel>, #tpu.dimension_semantics<parallel>, #tpu.dimension_semantics<arbitrary>], iteration_bounds = array<i64: 2, 1, 1>, scalar_prefetch = 0 : i64, scratch_operands = 3 : i64, tpu.core_type = #tpu.core_type<tc>, window_params = [{transform_indices = @transform_0, window_bounds = array<i64: 2, 128, 64>}, {transform_indices = @transform_1, window_bounds = array<i64: 2, 128, 64>}, {transform_indices = @transform_2, window_bounds = array<i64: 2, 128, 64>}, {transform_indices = @transform_3, window_bounds = array<i64: 2, 128, 128>}, {transform_indices = @transform_4, window_bounds = array<i64: 2, 128, 64>}]} {
    %c0_i32 = arith.constant 0 : i32
    %0 = arith.cmpi eq, %arg2, %c0_i32 : i32
    %1 = arith.extui %0 : i1 to i32
    %c0_i32_0 = arith.constant 0 : i32
    %2 = arith.cmpi ne, %1, %c0_i32_0 : i32
    scf.if %2 {
      %cst_35 = arith.constant -1.000000e+30 : f32
      %36 = vector.broadcast %cst_35 : f32 to vector<2x128x1xf32>
      %c0_36 = arith.constant 0 : index
      %c0_37 = arith.constant 0 : index
      %c0_38 = arith.constant 0 : index
      %37 = vector.load %arg8[%c0_36, %c0_37, %c0_38] : memref<2x128x1xf32, #tpu.memory_space<vmem>>, vector<2x128x1xf32>
      tpu.vector_store %arg8[%c0_36, %c0_37, %c0_38], %36 {strides = array<i32>} : memref<2x128x1xf32, #tpu.memory_space<vmem>>, vector<2x128x1xf32>,
      %cst_39 = arith.constant 0.000000e+00 : f32
      %38 = vector.broadcast %cst_39 : f32 to vector<2x128x1xf32>
      %c0_40 = arith.constant 0 : index
      %c0_41 = arith.constant 0 : index
      %c0_42 = arith.constant 0 : index
      %39 = vector.load %arg9[%c0_40, %c0_41, %c0_42] : memref<2x128x1xf32, #tpu.memory_space<vmem>>, vector<2x128x1xf32>
      tpu.vector_store %arg9[%c0_40, %c0_41, %c0_42], %38 {strides = array<i32>} : memref<2x128x1xf32, #tpu.memory_space<vmem>>, vector<2x128x1xf32>,
      %cst_43 = arith.constant 0.000000e+00 : f32
      %40 = vector.broadcast %cst_43 : f32 to vector<2x128x64xf32>
      %c0_44 = arith.constant 0 : index
      %c0_45 = arith.constant 0 : index
      %c0_46 = arith.constant 0 : index
      %41 = vector.load %arg10[%c0_44, %c0_45, %c0_46] : memref<2x128x64xf32, #tpu.memory_space<vmem>>, vector<2x128x64xf32>
      tpu.vector_store %arg10[%c0_44, %c0_45, %c0_46], %40 {strides = array<i32>} : memref<2x128x64xf32, #tpu.memory_space<vmem>>, vector<2x128x64xf32>,
    } else {
    }
    %c0 = arith.constant 0 : index
    %c0_1 = arith.constant 0 : index
    %c0_2 = arith.constant 0 : index
    %3 = vector.load %arg3[%c0, %c0_1, %c0_2] : memref<2x128x64xbf16, #tpu.memory_space<vmem>>, vector<2x128x64xbf16>
    %c0_3 = arith.constant 0 : index
    %c0_4 = arith.constant 0 : index
    %c0_5 = arith.constant 0 : index
    %4 = vector.load %arg4[%c0_3, %c0_4, %c0_5] : memref<2x128x64xbf16, #tpu.memory_space<vmem>>, vector<2x128x64xbf16>
    "tpu.trace_start"() <{level = 10 : i32, message = "gqd,gkd->gqk"}> : () -> ()
    %cst = arith.constant dense<0.000000e+00> : vector<2x128x128xf32>
    %5 = tpu.matmul %3, %4, %cst {dimension_numbers = #tpu.dot_dimension_numbers<[2], [2], [1], [1], [0, 0, 0, 1, 1, 1], [0], [0]>} : vector<2x128x64xbf16>, vector<2x128x64xbf16>, vector<2x128x128xf32> -> vector<2x128x128xf32>
    "tpu.trace_stop"() : () -> ()
    %c0_6 = arith.constant 0 : index
    %c0_7 = arith.constant 0 : index
    %c0_8 = arith.constant 0 : index
    %6 = vector.load %arg6[%c0_6, %c0_7, %c0_8] : memref<2x128x128xbf16, #tpu.memory_space<vmem>>, vector<2x128x128xbf16>
    %7 = arith.extf %6 : vector<2x128x128xbf16> to vector<2x128x128xf32>
    %8 = arith.addf %5, %7 : vector<2x128x128xf32>
    %c0_9 = arith.constant 0 : index
    %c0_10 = arith.constant 0 : index
    %c0_11 = arith.constant 0 : index
    %9 = vector.load %arg8[%c0_9, %c0_10, %c0_11] : memref<2x128x1xf32, #tpu.memory_space<vmem>>, vector<2x128x1xf32>
    %cst_12 = arith.constant dense<0xFF800000> : vector<2x128xf32>
    %10 = vector.multi_reduction <maximumf>, %8, %cst_12 [2] : vector<2x128x128xf32> to vector<2x128xf32>
    %11 = vector.shape_cast %10 : vector<2x128xf32> to vector<2x128x1xf32>
    %12 = arith.maximumf %9, %11 : vector<2x128x1xf32>
    %13 = arith.subf %9, %12 : vector<2x128x1xf32>
    %14 = math.exp %13 : vector<2x128x1xf32>
    %15 = vector.broadcast %12 : vector<2x128x1xf32> to vector<2x128x128xf32>
    %16 = arith.subf %8, %15 : vector<2x128x128xf32>
    %17 = math.exp %16 : vector<2x128x128xf32>
    %c0_13 = arith.constant 0 : index
    %c0_14 = arith.constant 0 : index
    %c0_15 = arith.constant 0 : index
    %18 = vector.load %arg9[%c0_13, %c0_14, %c0_15] : memref<2x128x1xf32, #tpu.memory_space<vmem>>, vector<2x128x1xf32>
    %19 = arith.mulf %14, %18 : vector<2x128x1xf32>
    %cst_16 = arith.constant dense<0.000000e+00> : vector<2x128xf32>
    %20 = vector.multi_reduction <add>, %17, %cst_16 [2] : vector<2x128x128xf32> to vector<2x128xf32>
    %21 = vector.shape_cast %20 : vector<2x128xf32> to vector<2x128x1xf32>
    %22 = arith.addf %19, %21 : vector<2x128x1xf32>
    %c0_17 = arith.constant 0 : index
    %c0_18 = arith.constant 0 : index
    %c0_19 = arith.constant 0 : index
    %23 = vector.load %arg9[%c0_17, %c0_18, %c0_19] : memref<2x128x1xf32, #tpu.memory_space<vmem>>, vector<2x128x1xf32>
    tpu.vector_store %arg9[%c0_17, %c0_18, %c0_19], %22 {strides = array<i32>} : memref<2x128x1xf32, #tpu.memory_space<vmem>>, vector<2x128x1xf32>,
    %c0_20 = arith.constant 0 : index
    %c0_21 = arith.constant 0 : index
    %c0_22 = arith.constant 0 : index
    %24 = vector.load %arg10[%c0_20, %c0_21, %c0_22] : memref<2x128x64xf32, #tpu.memory_space<vmem>>, vector<2x128x64xf32>
    %25 = vector.broadcast %14 : vector<2x128x1xf32> to vector<2x128x64xf32>
    %26 = arith.mulf %25, %24 : vector<2x128x64xf32>
    %27 = arith.truncf %17 : vector<2x128x128xf32> to vector<2x128x128xbf16>
    %c0_23 = arith.constant 0 : index
    %c0_24 = arith.constant 0 : index
    %c0_25 = arith.constant 0 : index
    %28 = vector.load %arg5[%c0_23, %c0_24, %c0_25] : memref<2x128x64xbf16, #tpu.memory_space<vmem>>, vector<2x128x64xbf16>
    "tpu.trace_start"() <{level = 10 : i32, message = "gqk,gkd->gqd"}> : () -> ()
    %cst_26 = arith.constant dense<0.000000e+00> : vector<2x128x64xf32>
    %29 = tpu.matmul %27, %28, %cst_26 {dimension_numbers = #tpu.dot_dimension_numbers<[2], [1], [1], [2], [0, 0, 0, 1, 1, 2], [0], [0]>} : vector<2x128x128xbf16>, vector<2x128x64xbf16>, vector<2x128x64xf32> -> vector<2x128x64xf32>
    "tpu.trace_stop"() : () -> ()
    %30 = arith.addf %26, %29 : vector<2x128x64xf32>
    %c0_27 = arith.constant 0 : index
    %c0_28 = arith.constant 0 : index
    %c0_29 = arith.constant 0 : index
    %31 = vector.load %arg10[%c0_27, %c0_28, %c0_29] : memref<2x128x64xf32, #tpu.memory_space<vmem>>, vector<2x128x64xf32>
    tpu.vector_store %arg10[%c0_27, %c0_28, %c0_29], %30 {strides = array<i32>} : memref<2x128x64xf32, #tpu.memory_space<vmem>>, vector<2x128x64xf32>,
    %c0_30 = arith.constant 0 : index
    %c0_31 = arith.constant 0 : index
    %c0_32 = arith.constant 0 : index
    %32 = vector.load %arg8[%c0_30, %c0_31, %c0_32] : memref<2x128x1xf32, #tpu.memory_space<vmem>>, vector<2x128x1xf32>
    tpu.vector_store %arg8[%c0_30, %c0_31, %c0_32], %12 {strides = array<i32>} : memref<2x128x1xf32, #tpu.memory_space<vmem>>, vector<2x128x1xf32>,
    %c0_i32_33 = arith.constant 0 : i32
    %33 = arith.cmpi eq, %arg2, %c0_i32_33 : i32
    %34 = arith.extui %33 : i1 to i32
    %c0_i32_34 = arith.constant 0 : i32
    %35 = arith.cmpi ne, %34, %c0_i32_34 : i32
    scf.if %35 {
      %c0_35 = arith.constant 0 : index
      %c0_36 = arith.constant 0 : index
      %c0_37 = arith.constant 0 : index
      %36 = vector.load %arg10[%c0_35, %c0_36, %c0_37] : memref<2x128x64xf32, #tpu.memory_space<vmem>>, vector<2x128x64xf32>
      %c0_38 = arith.constant 0 : index
      %c0_39 = arith.constant 0 : index
      %c0_40 = arith.constant 0 : index
      %37 = vector.load %arg9[%c0_38, %c0_39, %c0_40] : memref<2x128x1xf32, #tpu.memory_space<vmem>>, vector<2x128x1xf32>
      %38 = vector.broadcast %37 : vector<2x128x1xf32> to vector<2x128x64xf32>
      %39 = arith.divf %36, %38 : vector<2x128x64xf32>
      %c0_41 = arith.constant 0 : index
      %c0_42 = arith.constant 0 : index
      %c0_43 = arith.constant 0 : index
      %40 = vector.load %arg7[%c0_41, %c0_42, %c0_43] : memref<2x128x64xf32, #tpu.memory_space<vmem>>, vector<2x128x64xf32>
      tpu.vector_store %arg7[%c0_41, %c0_42, %c0_43], %39 {strides = array<i32>} : memref<2x128x64xf32, #tpu.memory_space<vmem>>, vector<2x128x64xf32>,
    } else {
    }
    return
  }
  func.func @transform_0(%arg0: i32, %arg1: i32, %arg2: i32) -> (i32, i32, i32) {
    %c0_i32 = arith.constant 0 : i32
    %c0_i32_0 = arith.constant 0 : i32
    return %arg0, %arg1, %c0_i32 : i32, i32, i32
  }
  func.func @transform_1(%arg0: i32, %arg1: i32, %arg2: i32) -> (i32, i32, i32) {
    %c0_i32 = arith.constant 0 : i32
    %c0_i32_0 = arith.constant 0 : i32
    return %arg0, %arg2, %c0_i32 : i32, i32, i32
  }
  func.func @transform_2(%arg0: i32, %arg1: i32, %arg2: i32) -> (i32, i32, i32) {
    %c0_i32 = arith.constant 0 : i32
    %c0_i32_0 = arith.constant 0 : i32
    return %arg0, %arg2, %c0_i32 : i32, i32, i32
  }
  func.func @transform_3(%arg0: i32, %arg1: i32, %arg2: i32) -> (i32, i32, i32) {
    %c0_i32 = arith.constant 0 : i32
    return %arg0, %arg1, %arg2 : i32, i32, i32
  }
  func.func @transform_4(%arg0: i32, %arg1: i32, %arg2: i32) -> (i32, i32, i32) {
    %c0_i32 = arith.constant 0 : i32
    %c0_i32_0 = arith.constant 0 : i32
    return %arg0, %arg1, %c0_i32 : i32, i32, i32
  }
}

</mosaic_0001>

<bundles_post_ra>
// kernel: tpu_custom_call.1
= control target key start
LH: loop header
LB: loop body
LE: loop exit
PB: predicated region body
PF: predicated region fallthrough
CT: control target
= control target key end

     0   :  { %s3571_s15 = smov 0   ;;  %s3573_s16 = smov 0   ;;  %s4801_s0 = inlined_call_operand.vmem [shape: bf16[4,128,64], index: 0, kind: input, shape index: {}]   ;;  %s4802_s1 = inlined_call_operand.vmem [shape: bf16[4,128,64], index: 1, kind: input, shape index: {}]   ;;  %s4803_s2 = inlined_call_operand.vmem [shape: bf16[4,128,64], index: 2, kind: input, shape index: {}]   ;;  %s4804_s3 = inlined_call_operand.vmem [shape: bf16[4,128,128], index: 3, kind: input, shape index: {}]   ;;  %s4805_s4 = inlined_call_operand.vmem [shape: f32[4,128,64], index: 4, kind: output, shape index: {}]  }
   0x1   :  { %s3575_s17 = smov 0  }
   0x2 LB: > { %s33_s18 = sadd.s32 1, %s3537_s16  ;;  %p2876_p0 = scmp.ge.s32.totalorder %s3541_s17, 1  ;;  %s3541_s17 = sphi %s3575_s17, %s14_s17   ;;  %s3537_s16 = sphi %s3573_s16, %s4929_s16   ;;  %s3533_s15 = sphi %s3571_s15, %s4928_s15  }
   0x3   : > { %p35_p1 = scmp.ge.s32.totalorder %s33_s18, 2  ;;  %p254_p2 = scmp.lt.s32.totalorder %s3541_s17, 3 }
   0x5   : > { %s4931_s18 = smov (%p35_p1, %s33_s18), 0  ;;  %p255_p3 = pnand %p2876_p0, %p254_p2 }
   0x7   : > { %258 = sbr.rel (%p255_p3) target bundleno = 975 (0x3cf), region = 36 }
   0xe   : > { %s2877_s19 = sshll.u32 %s3533_s15, 1  ;;  %vm456_vm0 = vcmask 523264   ;;  %vm391_vm1 = vcmask 7168   ;;  %v3543_v48 = vmov -1e+30  }
   0xf   : > { %p325_p4 = scmp.lt.s32.totalorder %s2877_s19, 3  ;;  %410 = vst.msk [vmem:[#allocation2 + $0x90] sm:$0xff] %vm391_vm1, %v3543_v48  ;;  %392 = vst.msk [vmem:[#allocation2] sm:$0xff] %vm391_vm1, %v3543_v48 }
  0x10   : > { %393 = vst.msk [vmem:[#allocation2 + $0x8] sm:$0xff] %vm391_vm1, %v3543_v48  ;;  %394 = vst.msk [vmem:[#allocation2 + $0x10] sm:$0xff] %vm391_vm1, %v3543_v48 }
  0x11   : > { %s4933_s19 = smov (!%p325_p4, %s2877_s19), 3  ;;  %395 = vst.msk [vmem:[#allocation2 + $0x18] sm:$0xff] %vm391_vm1, %v3543_v48  ;;  %396 = vst.msk [vmem:[#allocation2 + $0x20] sm:$0xff] %vm391_vm1, %v3543_v48 }
  0x12   : > { %s3592_s20 = sshll.u32 %s4933_s19, 6  ;;  %397 = vst.msk [vmem:[#allocation2 + $0x28] sm:$0xff] %vm391_vm1, %v3543_v48  ;;  %398 = vst.msk [vmem:[#allocation2 + $0x30] sm:$0xff] %vm391_vm1, %v3543_v48  ;;  %s2962_s7 = sshll.u32 %s4933_s19, 7 }
  0x13   : > { %s3598_s23 = scalar_lea.vmem %s4802_s1, %s3592_s20  ;;  %s3620_s26 = scalar_lea.vmem %s4801_s0, %s3592_s20  ;;  %399 = vst.msk [vmem:[#allocation2 + $0x38] sm:$0xff] %vm391_vm1, %v3543_v48  ;;  %400 = vst.msk [vmem:[#allocation2 + $0x40] sm:$0xff] %vm391_vm1, %v3543_v48 }
  0x14   : > { %v3279_v0 = vld [vmem:[%s3598_s23] sm:$0xff]   ;;  %v3281_v3 = vld [vmem:[%s3598_s23 + $0x8] sm:$0xff]   ;;  %v3283_v7 = vld [vmem:[%s3598_s23 + $0x10] sm:$0xff]   ;;  %401 = vst.msk [vmem:[#allocation2 + $0x48] sm:$0xff] %vm391_vm1, %v3543_v48  ;;  %s3722_s29 = scalar_lea.vmem %s4804_s3, %s3592_s20  ;;  %s4046_s6 = scalar_lea.vmem %s4803_s2, %s3592_s20 }
  0x15   : > { %v3280_v1 = vld [vmem:[%s3598_s23 + $0x40] sm:$0xff]   ;;  %3234 = vmatprep.subr.msk.bf16.mxu0 %vm456_vm0, %v3279_v0  ;;  %v723_v2 = vsel %vm456_vm0, %v3279_v0, 0  ;;  %v3282_v5 = vld [vmem:[%s3598_s23 + $0x48] sm:$0xff]   ;;  %v726_v6 = vsel %vm456_vm0, %v3281_v3, 0  ;;  %v3284_v9 = vld [vmem:[%s3598_s23 + $0x50] sm:$0xff]   ;;  %v729_v12 = vsel %vm456_vm0, %v3283_v7, 0  ;;  %s4726_s10 = scalar_lea.vmem %s4805_s4, %s2962_s7 }
  0x16   : > { %3242 = vmatprep.subr.msk.bf16.mxu1 %vm456_vm0, %v3280_v1  ;;  %3107 = vmatpush3.bf16.xpose.msra.mxu0 %v723_v2  ;;  %v948_v4 = vsel %vm456_vm0, %v3280_v1, 0  ;;  %v951_v8 = vsel %vm456_vm0, %v3282_v5, 0  ;;  %v3285_v10 = vld [vmem:[%s3598_s23 + $0x18] sm:$0xff]   ;;  %v3295_v13 = vld [vmem:[%s3620_s26] sm:$0xff]   ;;  %v954_v14 = vsel %vm456_vm0, %v3284_v9, 0  ;;  %v3289_v21 = vld [vmem:[%s3598_s23 + $0x28] sm:$0xff]  }
  0x17   : > { %3139 = vmatpush3.bf16.xpose.msra.mxu1 %v948_v4  ;;  %3235 = vmatprep.subr.msk.bf16.mxu0 %vm456_vm0, %v3281_v3  ;;  %v3286_v11 = vld [vmem:[%s3598_s23 + $0x58] sm:$0xff]   ;;  %v3296_v15 = vld [vmem:[%s3620_s26 + $0x40] sm:$0xff]   ;;  %v732_v16 = vsel %vm456_vm0, %v3285_v10, 0  ;;  %v3290_v23 = vld [vmem:[%s3598_s23 + $0x68] sm:$0xff]   ;;  %v738_v24 = vsel %vm456_vm0, %v3289_v21, 0  ;;  %402 = vst.msk [vmem:[#allocation2 + $0x50] sm:$0xff] %vm391_vm1, %v3543_v48 }
  0x18   : > { %3243 = vmatprep.subr.msk.bf16.mxu1 %vm456_vm0, %v3282_v5  ;;  %3122 = vmatprep.mubr.msk.bf16.mxu0 %vm456_vm0, %v3295_v13  ;;  %v3287_v17 = vld [vmem:[%s3598_s23 + $0x20] sm:$0xff]   ;;  %v957_v18 = vsel %vm456_vm0, %v3286_v11, 0  ;;  %v3291_v25 = vld [vmem:[%s3598_s23 + $0x30] sm:$0xff]   ;;  %v963_v26 = vsel %vm456_vm0, %v3290_v23, 0  ;;  %v3293_v29 = vld [vmem:[%s3598_s23 + $0x38] sm:$0xff]   ;;  %403 = vst.msk [vmem:[#allocation2 + $0x58] sm:$0xff] %vm391_vm1, %v3543_v48 }
  0x19   : > { %3154 = vmatprep.mubr.msk.bf16.mxu1 %vm456_vm0, %v3296_v15  ;;  %v3288_v19 = vld [vmem:[%s3598_s23 + $0x60] sm:$0xff]   ;;  %v735_v20 = vsel %vm456_vm0, %v3287_v17, 0  ;;  %v3292_v27 = vld [vmem:[%s3598_s23 + $0x70] sm:$0xff]   ;;  %v741_v28 = vsel %vm456_vm0, %v3291_v25, 0  ;;  %v3294_v31 = vld [vmem:[%s3598_s23 + $0x78] sm:$0xff]   ;;  %v744_v32 = vsel %vm456_vm0, %v3293_v29, 0 }
  0x1a   : > { %v960_v22 = vsel %vm456_vm0, %v3288_v19, 0  ;;  %v966_v30 = vsel %vm456_vm0, %v3292_v27, 0  ;;  %v969_v33 = vsel %vm456_vm0, %v3294_v31, 0  ;;  %v3297_v34 = vld [vmem:[%s3620_s26 + $0x8] sm:$0xff]   ;;  %v3299_v36 = vld [vmem:[%s3620_s26 + $0x10] sm:$0xff]   ;;  %v3300_v38 = vld [vmem:[%s3620_s26 + $0x18] sm:$0xff]  }
  0x1b   : > { %v3298_v35 = vld [vmem:[%s3620_s26 + $0x48] sm:$0xff]   ;;  %v3301_v37 = vld [vmem:[%s3620_s26 + $0x50] sm:$0xff]   ;;  %v3302_v39 = vld [vmem:[%s3620_s26 + $0x58] sm:$0xff]   ;;  %404 = vst.msk [vmem:[#allocation2 + $0x60] sm:$0xff] %vm391_vm1, %v3543_v48 }
  0x1c   : > { %v3303_v40 = vld [vmem:[%s3620_s26 + $0x20] sm:$0xff]   ;;  %v3304_v42 = vld [vmem:[%s3620_s26 + $0x28] sm:$0xff]   ;;  %v3307_v44 = vld [vmem:[%s3620_s26 + $0x30] sm:$0xff]   ;;  %405 = vst.msk [vmem:[#allocation2 + $0x68] sm:$0xff] %vm391_vm1, %v3543_v48 }
  0x1d   : > { %v3305_v41 = vld [vmem:[%s3620_s26 + $0x60] sm:$0xff]   ;;  %v3306_v43 = vld [vmem:[%s3620_s26 + $0x68] sm:$0xff]   ;;  %v3309_v45 = vld [vmem:[%s3620_s26 + $0x70] sm:$0xff]   ;;  %406 = vst.msk [vmem:[#allocation2 + $0x70] sm:$0xff] %vm391_vm1, %v3543_v48 }
  0x1e   : > { %3109 = vmatpush3.bf16.xpose.msra.mxu0 %v726_v6  ;;  %v3308_v46 = vld [vmem:[%s3620_s26 + $0x38] sm:$0xff]   ;;  %407 = vst.msk [vmem:[#allocation2 + $0x78] sm:$0xff] %vm391_vm1, %v3543_v48  ;;  %408 = vst.msk [vmem:[#allocation2 + $0x80] sm:$0xff] %vm391_vm1, %v3543_v48  ;;  %v3027_v49 = vld [vmem:[%s3722_s29 + $0x8] sm:$0xff]  }
  0x1f   : > { %3141 = vmatpush3.bf16.xpose.msra.mxu1 %v951_v8  ;;  %3236 = vmatprep.subr.msk.bf16.mxu0 %vm456_vm0, %v3283_v7  ;;  %v3310_v47 = vld [vmem:[%s3620_s26 + $0x78] sm:$0xff]   ;;  %409 = vst.msk [vmem:[#allocation2 + $0x88] sm:$0xff] %vm391_vm1, %v3543_v48  ;;  %411 = vst.msk [vmem:[#allocation2 + $0x98] sm:$0xff] %vm391_vm1, %v3543_v48  ;;  %v3035_v50 = vld [vmem:[%s3722_s29 + $0x48] sm:$0xff]   ;;  %v2969_v51 = vunpack.c.l.bf16 %v3027_v49  ;;  %v2970_v58 = vunpack.c.h.bf16 %v3027_v49 }
  0x20   : > { %3244 = vmatprep.subr.msk.bf16.mxu1 %vm456_vm0, %v3284_v9  ;;  %412 = vst.msk [vmem:[#allocation2 + $0xa0] sm:$0xff] %vm391_vm1, %v3543_v48  ;;  %413 = vst.msk [vmem:[#allocation2 + $0xa8] sm:$0xff] %vm391_vm1, %v3543_v48  ;;  %v3001_v52 = vunpack.c.l.bf16 %v3035_v50  ;;  %v2964_v53 = vld [vmem:[%s3722_s29] sm:$0xff]   ;;  %v3002_v4 = vunpack.c.h.bf16 %v3035_v50  ;;  %v3029_v7 = vld [vmem:[%s3722_s29 + $0x18] sm:$0xff]  }
  0x21   : > { %414 = vst.msk [vmem:[#allocation2 + $0xb0] sm:$0xff] %vm391_vm1, %v3543_v48  ;;  %415 = vst.msk [vmem:[#allocation2 + $0xb8] sm:$0xff] %vm391_vm1, %v3543_v48  ;;  %v2965_v60 = vunpack.c.l.bf16 %v2964_v53  ;;  %v3034_v63 = vld [vmem:[%s3722_s29 + $0x40] sm:$0xff]  }
  0x22   : > { %416 = vst.msk [vmem:[#allocation2 + $0xc0] sm:$0xff] %vm391_vm1, %v3543_v48  ;;  %417 = vst.msk [vmem:[#allocation2 + $0xc8] sm:$0xff] %vm391_vm1, %v3543_v48  ;;  %v2997_v6 = vunpack.c.l.bf16 %v3034_v63 }
  0x23   : > { %418 = vst.msk [vmem:[#allocation2 + $0xd0] sm:$0xff] %vm391_vm1, %v3543_v48  ;;  %419 = vst.msk [vmem:[#allocation2 + $0xd8] sm:$0xff] %vm391_vm1, %v3543_v48 }
  0x24   : > { %420 = vst.msk [vmem:[#allocation2 + $0xe0] sm:$0xff] %vm391_vm1, %v3543_v48  ;;  %421 = vst.msk [vmem:[#allocation2 + $0xe8] sm:$0xff] %vm391_vm1, %v3543_v48 }
  0x25   : > { %422 = vst.msk [vmem:[#allocation2 + $0xf0] sm:$0xff] %vm391_vm1, %v3543_v48  ;;  %423 = vst.msk [vmem:[#allocation2 + $0xf8] sm:$0xff] %vm391_vm1, %v3543_v48 }
  0x26   : > { %3111 = vmatpush3.bf16.xpose.msra.mxu0 %v729_v12 }
  0x27   : > { %3143 = vmatpush3.bf16.xpose.msra.mxu1 %v954_v14  ;;  %3237 = vmatprep.subr.msk.bf16.mxu0 %vm456_vm0, %v3285_v10  ;;  %v2998_v10 = vunpack.c.h.bf16 %v3034_v63  ;;  %v2966_v14 = vunpack.c.h.bf16 %v2964_v53 }
  0x28   : > { %3245 = vmatprep.subr.msk.bf16.mxu1 %vm456_vm0, %v3286_v11 }
  0x2e   : > { %3113 = vmatpush3.bf16.xpose.msra.mxu0 %v732_v16 }
  0x2f   : > { %3145 = vmatpush3.bf16.xpose.msra.mxu1 %v957_v18  ;;  %3238 = vmatprep.subr.msk.bf16.mxu0 %vm456_vm0, %v3287_v17  ;;  %v2978_v17 = vunpack.c.h.bf16 %v3029_v7 }
  0x30   : > { %3246 = vmatprep.subr.msk.bf16.mxu1 %vm456_vm0, %v3288_v19 }
  0x36   : > { %3115 = vmatpush3.bf16.xpose.msra.mxu0 %v735_v20  ;;  %v2977_v20 = vunpack.c.l.bf16 %v3029_v7 }
  0x37   : > { %3147 = vmatpush3.bf16.xpose.msra.mxu1 %v960_v22  ;;  %3239 = vmatprep.subr.msk.bf16.mxu0 %vm456_vm0, %v3289_v21  ;;  %v3037_v21 = vld [vmem:[%s3722_s29 + $0x58] sm:$0xff]  }
  0x38   : > { %3247 = vmatprep.subr.msk.bf16.mxu1 %vm456_vm0, %v3290_v23 }
  0x3e   : > { %3117 = vmatpush3.bf16.xpose.msra.mxu0 %v738_v24 }
  0x3f   : > { %3149 = vmatpush3.bf16.xpose.msra.mxu1 %v963_v26  ;;  %3240 = vmatprep.subr.msk.bf16.mxu0 %vm456_vm0, %v3291_v25  ;;  %v3010_v26 = vunpack.c.h.bf16 %v3037_v21 }
  0x40   : > { %3248 = vmatprep.subr.msk.bf16.mxu1 %vm456_vm0, %v3292_v27 }
  0x46   : > { %3119 = vmatpush3.bf16.xpose.msra.mxu0 %v741_v28  ;;  %v3009_v28 = vunpack.c.l.bf16 %v3037_v21 }
  0x47   : > { %3151 = vmatpush3.bf16.xpose.msra.mxu1 %v966_v30  ;;  %3241 = vmatprep.subr.msk.bf16.mxu0 %vm456_vm0, %v3293_v29 }
  0x48   : > { %3249 = vmatprep.subr.msk.bf16.mxu1 %vm456_vm0, %v3294_v31 }
  0x4e   : > { %3121 = vmatpush3.bf16.xpose.msra.mxu0 %v744_v32  ;;  %v3028_v32 = vld [vmem:[%s3722_s29 + $0x10] sm:$0xff]  }
  0x4f   : > { %3153 = vmatpush3.bf16.xpose.msra.mxu1 %v969_v33 }
  0x55   : > { %3123 = vmatmul.mubr.msk.bf16.vlgmr.msra.gmra.mrb[0].mxu0 %vm456_vm0, %v3297_v34 }
  0x56   : > { %3155 = vmatmul.mubr.msk.bf16.vlgmr.msra.gmra.mrb[0].mxu1 %vm456_vm0, %v3298_v35  ;;  %3126 = vmatprep.mubr.msk.bf16.mxu0 %vm456_vm0, %v3299_v36 }
  0x57   : > { %3158 = vmatprep.mubr.msk.bf16.mxu1 %vm456_vm0, %v3301_v37 }
  0x5d   : > { %3127 = vmatmul.mubr.msk.bf16.gmra.mrb[4].mxu0 %vm456_vm0, %v3300_v38  ;;  %v3544_v38 = vmov 0  }
  0x5e   : > { %3159 = vmatmul.mubr.msk.bf16.gmra.mrb[4].mxu1 %vm456_vm0, %v3302_v39  ;;  %3130 = vmatprep.mubr.msk.bf16.mxu0 %vm456_vm0, %v3303_v40 }
  0x5f   : > { %3162 = vmatprep.mubr.msk.bf16.mxu1 %vm456_vm0, %v3305_v41  ;;  %3278 = vset.pattern.permute.xlu0 %v3544_v38  ;;  %v2974_v41 = vunpack.c.h.bf16 %v3028_v32 }
  0x60   : > { %3277 = vset.pattern.permute.xlu1 %v3544_v38 }
  0x65   : > { %3131 = vmatmul.mubr.msk.bf16.gmra.mrb[8].mxu0 %vm456_vm0, %v3304_v42  ;;  %v2973_v42 = vunpack.c.l.bf16 %v3028_v32  ;;  %v3032_v32 = vld [vmem:[%s3722_s29 + $0x30] sm:$0xff]  }
  0x66   : > { %3163 = vmatmul.mubr.msk.bf16.gmra.mrb[8].mxu1 %vm456_vm0, %v3306_v43  ;;  %3134 = vmatprep.mubr.msk.bf16.mxu0 %vm456_vm0, %v3307_v44  ;;  %v3786_v43 = vld [vmem:[%s3722_s29 + $0x50] sm:$0xff]   ;;  %v3791_v44 = vld [vmem:[%s3722_s29 + $0x28] sm:$0xff]  }
  0x67   : > { %3166 = vmatprep.mubr.msk.bf16.mxu1 %vm456_vm0, %v3309_v45 }
  0x6d   : > { %3135 = vmatmul.mubr.msk.bf16.gmra.mrb[12].mxu0 %vm456_vm0, %v3308_v46 }
  0x6e   : > { %3167 = vmatmul.mubr.msk.bf16.gmra.mrb[12].mxu1 %vm456_vm0, %v3310_v47  ;;  %v3006_v47 = vunpack.c.h.bf16 %v3786_v43 }
 0x128   : > { %v3124_v54 = vpop.f32.mrb[0].mxu0 }
 0x129   : > { %v3727_v55 = vadd.f32 %v3124_v54, %v2969_v51  ;;  %v3156_v56 = vpop.f32.mrb[0].mxu1  ;;  %v780_v57 = vpop.f32.mrb[1].mxu0  ;;  %v3005_v51 = vunpack.c.l.bf16 %v3786_v43  ;;  %v2986_v54 = vunpack.c.h.bf16 %v3791_v44 }
 0x12a   : > { %v3729_v59 = vadd.f32 %v3156_v56, %v3001_v52  ;;  %v1005_v61 = vpop.f32.mrb[1].mxu1  ;;  %v3125_v62 = vpop.f32.mrb[2].mxu0  ;;  %v3736_v5 = vadd.f32 %v2965_v60, %v780_v57  ;;  %v3818_v60 = vld [vmem:[%s3722_s29 + $0x68] sm:$0xff]  }
 0x12b   : > { %v3157_v0 = vpop.f32.mrb[2].mxu1  ;;  %1104 = vmax.xlane.f32.xlu1 %v3727_v55  ;;  %v783_v1 = vpop.f32.mrb[3].mxu0  ;;  %v3734_v3 = vadd.f32 %v3125_v62, %v2970_v58  ;;  %v3743_v13 = vadd.f32 %v2997_v6, %v1005_v61  ;;  %v2985_v58 = vunpack.c.l.bf16 %v3791_v44  ;;  %v3545_v62 = vmov 0.0   ;;  %v3030_v6 = vld [vmem:[%s3722_s29 + $0x20] sm:$0xff]  }
 0x12c   : > { %4838 = vst [vmem:[#allocation5_spill] sm:$0xff] %v3729_v59  ;;  %1136 = vmax.xlane.f32.xlu0 %v3729_v59  ;;  %v1008_v2 = vpop.f32.mrb[3].mxu1  ;;  %4840 = vst [vmem:[#allocation7_spill] sm:$0xff] %v3736_v5  ;;  %v3741_v9 = vadd.f32 %v3157_v0, %v3002_v4  ;;  %v3754_v24 = vadd.f32 %v2966_v14, %v783_v1  ;;  %v3017_v7 = vunpack.c.l.bf16 %v3818_v60  ;;  %v3038_v14 = vld [vmem:[%s3722_s29 + $0x60] sm:$0xff]  }
 0x12d   : > { %4839 = vst [vmem:[#allocation6_spill] sm:$0xff] %v3734_v3  ;;  %4842 = vst [vmem:[#allocation9_spill] sm:$0xff] %v3743_v13  ;;  %v3752_v23 = vadd.f32 %v2998_v10, %v1008_v2  ;;  %v3018_v2 = vunpack.c.h.bf16 %v3818_v60  ;;  %v2982_v10 = vunpack.c.h.bf16 %v3030_v6  ;;  %v3322_v60 = vld [vmem:[%s4046_s6 + $0x28] sm:$0xff]  }
 0x12e   : > { %4841 = vst [vmem:[#allocation8_spill] sm:$0xff] %v3741_v9  ;;  %4844 = vst [vmem:[#allocation11_spill] sm:$0xff] %v3754_v24 }
 0x12f   : > { %1106 = vmax.xlane.f32.xlu1 %v3734_v3  ;;  %4843 = vst [vmem:[#allocation10_spill] sm:$0xff] %v3752_v23  ;;  %457 = vst.msk [vmem:[#allocation4] sm:$0xff] %vm456_vm0, %v3545_v62  ;;  %v4301_v3 = vld [vmem:[#allocation2 + $0xe8] sm:$0xff] }
 0x130   : > { %1100 = vmax.xlane.f32.xlu0 %v3736_v5  ;;  %v3128_v8 = vpop.f32.mrb[4].mxu0  ;;  %424 = vst.msk [vmem:[#allocation3] sm:$0xff] %vm391_vm1, %v3545_v62  ;;  %425 = vst.msk [vmem:[#allocation3 + $0x8] sm:$0xff] %vm391_vm1, %v3545_v62 }
 0x131   : > { %v796_v11 = vpop.f32.mrb[5].mxu0  ;;  %v3160_v12 = vpop.f32.mrb[4].mxu1  ;;  %v3759_v27 = vadd.f32 %v3128_v8, %v2977_v20  ;;  %426 = vst.msk [vmem:[#allocation3 + $0x10] sm:$0xff] %vm391_vm1, %v3545_v62  ;;  %427 = vst.msk [vmem:[#allocation3 + $0x18] sm:$0xff] %vm391_vm1, %v3545_v62 }
 0x132   : > { %v3129_v15 = vpop.f32.mrb[6].mxu0  ;;  %v3745_v16 = vpop.f32.mrb[5].mxu1  ;;  %v3780_v39 = vadd.f32 %v3160_v12, %v3009_v28  ;;  %v3802_v50 = vadd.f32 %v2973_v42, %v796_v11  ;;  %428 = vst.msk [vmem:[#allocation3 + $0x20] sm:$0xff] %vm391_vm1, %v3545_v62  ;;  %429 = vst.msk [vmem:[#allocation3 + $0x28] sm:$0xff] %vm391_vm1, %v3545_v62  ;;  %v2981_v11 = vunpack.c.l.bf16 %v3030_v6  ;;  %v3041_v28 = vld [vmem:[%s3722_s29 + $0x78] sm:$0xff]   ;;  %v3313_v6 = vld [vmem:[%s4046_s6 + $0x48] sm:$0xff]  }
 0x133   : > { %1138 = vmax.xlane.f32.xlu1 %v3741_v9  ;;  %v799_v18 = vpop.f32.mrb[7].mxu0  ;;  %v3161_v19 = vpop.f32.mrb[6].mxu1  ;;  %v3757_v25 = vadd.f32 %v3129_v15, %v2978_v17  ;;  %4846 = vst [vmem:[#allocation13_spill] sm:$0xff] %v3759_v27  ;;  %430 = vst.msk [vmem:[#allocation3 + $0x30] sm:$0xff] %vm391_vm1, %v3545_v62  ;;  %v3958_v0 = vadd.f32 %v3005_v51, %v3745_v16  ;;  %v3014_v16 = vunpack.c.h.bf16 %v3038_v14 }
 0x134   : > { %1132 = vmax.xlane.f32.xlu0 %v3743_v13  ;;  %v3750_v22 = vpop.f32.mrb[7].mxu1  ;;  %v3774_v35 = vadd.f32 %v3161_v19, %v3010_v26  ;;  %4848 = vst [vmem:[#allocation15_spill] sm:$0xff] %v3780_v39  ;;  %v3795_v46 = vadd.f32 %v2974_v41, %v799_v18  ;;  %4850 = vst [vmem:[#allocation17_spill] sm:$0xff] %v3802_v50  ;;  %v3013_v18 = vunpack.c.l.bf16 %v3038_v14  ;;  %v3033_v19 = vld [vmem:[%s3722_s29 + $0x38] sm:$0xff]  }
 0x135   : > { %4845 = vst [vmem:[#allocation12_spill] sm:$0xff] %v3757_v25  ;;  %431 = vst.msk [vmem:[#allocation3 + $0x38] sm:$0xff] %vm391_vm1, %v3545_v62  ;;  %v3953_v63 = vadd.f32 %v3006_v47, %v3750_v22  ;;  %v2994_v21 = vunpack.c.h.bf16 %v3033_v19  ;;  %v2993_v26 = vunpack.c.l.bf16 %v3033_v19  ;;  %v3314_v19 = vld [vmem:[%s4046_s6 + $0x8] sm:$0xff]  }
 0x136   : > { %4847 = vst [vmem:[#allocation14_spill] sm:$0xff] %v3774_v35  ;;  %4849 = vst [vmem:[#allocation16_spill] sm:$0xff] %v3795_v46 }
 0x137   : > { %1134 = vmax.xlane.f32.xlu1 %v3752_v23  ;;  %432 = vst.msk [vmem:[#allocation3 + $0x40] sm:$0xff] %vm391_vm1, %v3545_v62  ;;  %433 = vst.msk [vmem:[#allocation3 + $0x48] sm:$0xff] %vm391_vm1, %v3545_v62 }
 0x138   : > { %1102 = vmax.xlane.f32.xlu0 %v3754_v24  ;;  %v3762_v29 = vpop.f32.mrb[8].mxu0  ;;  %434 = vst.msk [vmem:[#allocation3 + $0x50] sm:$0xff] %vm391_vm1, %v3545_v62  ;;  %435 = vst.msk [vmem:[#allocation3 + $0x58] sm:$0xff] %vm391_vm1, %v3545_v62 }
 0x139   : > { %v3764_v30 = vpop.f32.mrb[9].mxu0  ;;  %v3766_v31 = vpop.f32.mrb[8].mxu1  ;;  %436 = vst.msk [vmem:[#allocation3 + $0x60] sm:$0xff] %vm391_vm1, %v3545_v62  ;;  %437 = vst.msk [vmem:[#allocation3 + $0x68] sm:$0xff] %vm391_vm1, %v3545_v62  ;;  %v3971_v4 = vadd.f32 %v3762_v29, %v2985_v58 }
 0x13a   : > { %v3769_v33 = vpop.f32.mrb[10].mxu0  ;;  %v3771_v34 = vpop.f32.mrb[9].mxu1  ;;  %438 = vst.msk [vmem:[#allocation3 + $0x70] sm:$0xff] %vm391_vm1, %v3545_v62  ;;  %439 = vst.msk [vmem:[#allocation3 + $0x78] sm:$0xff] %vm391_vm1, %v3545_v62  ;;  %v3980_v12 = vadd.f32 %v3766_v31, %v3017_v7  ;;  %v3989_v17 = vadd.f32 %v2981_v11, %v3764_v30  ;;  %v3026_v30 = vunpack.c.h.bf16 %v3041_v28  ;;  %v4073_v11 = vld [vmem:[#allocation2 + $0x98] sm:$0xff] }
 0x13b   : > { %1114 = vmax.xlane.f32.xlu1 %v3757_v25  ;;  %v3776_v36 = vpop.f32.mrb[10].mxu1  ;;  %v3778_v37 = vpop.f32.mrb[11].mxu0  ;;  %440 = vst.msk [vmem:[#allocation3 + $0x80] sm:$0xff] %vm391_vm1, %v3545_v62  ;;  %441 = vst.msk [vmem:[#allocation3 + $0x88] sm:$0xff] %vm391_vm1, %v3545_v62  ;;  %v3964_v1 = vadd.f32 %v3769_v33, %v2986_v54  ;;  %v3998_v22 = vadd.f32 %v3013_v18, %v3771_v34  ;;  %v3025_v33 = vunpack.c.l.bf16 %v3041_v28  ;;  %v4252_v25 = vld [vmem:[#allocation2 + $0x78] sm:$0xff] }
 0x13c   : > { %1112 = vmax.xlane.f32.xlu0 %v3759_v27  ;;  %v3783_v40 = vpop.f32.mrb[11].mxu1  ;;  %442 = vst.msk [vmem:[#allocation3 + $0x90] sm:$0xff] %vm391_vm1, %v3545_v62  ;;  %443 = vst.msk [vmem:[#allocation3 + $0x98] sm:$0xff] %vm391_vm1, %v3545_v62  ;;  %v3977_v8 = vadd.f32 %v3776_v36, %v3018_v2  ;;  %v3986_v15 = vadd.f32 %v2982_v10, %v3778_v37  ;;  %v2990_v36 = vunpack.c.h.bf16 %v3032_v32  ;;  %v2989_v37 = vunpack.c.l.bf16 %v3032_v32  ;;  %v3312_v2 = vld [vmem:[%s4046_s6] sm:$0xff]   ;;  %v4283_v27 = vld [vmem:[#allocation2 + $0x68] sm:$0xff] }
 0x13d   : > { %444 = vst.msk [vmem:[#allocation3 + $0xa0] sm:$0xff] %vm391_vm1, %v3545_v62  ;;  %445 = vst.msk [vmem:[#allocation3 + $0xa8] sm:$0xff] %vm391_vm1, %v3545_v62  ;;  %v3995_v20 = vadd.f32 %v3014_v16, %v3783_v40  ;;  %v3040_v40 = vld [vmem:[%s3722_s29 + $0x70] sm:$0xff]   ;;  %v4076_v16 = vld [vmem:[#allocation2 + $0x80] sm:$0xff]  ;;  %3170 = vmatprep.subr.bf16.mxu0 %v3312_v2 }
 0x13e   : > { %446 = vst.msk [vmem:[#allocation3 + $0xb0] sm:$0xff] %vm391_vm1, %v3545_v62  ;;  %447 = vst.msk [vmem:[#allocation3 + $0xb8] sm:$0xff] %vm391_vm1, %v3545_v62  ;;  %v3022_v42 = vunpack.c.h.bf16 %v3040_v40  ;;  %v3021_v44 = vunpack.c.l.bf16 %v3040_v40  ;;  %3171 = vmatpush3.bf16.msra.mxu0 %v3312_v2 }
 0x13f   : > { %1146 = vmax.xlane.f32.xlu1 %v3774_v35  ;;  %448 = vst.msk [vmem:[#allocation3 + $0xc0] sm:$0xff] %vm391_vm1, %v3545_v62  ;;  %449 = vst.msk [vmem:[#allocation3 + $0xc8] sm:$0xff] %vm391_vm1, %v3545_v62  ;;  %3172 = vmatprep.subr.bf16.mxu0 %v3314_v19 }
 0x140   : > { %1144 = vmax.xlane.f32.xlu0 %v3780_v39  ;;  %v3793_v45 = vpop.f32.mrb[12].mxu0  ;;  %450 = vst.msk [vmem:[#allocation3 + $0xd0] sm:$0xff] %vm391_vm1, %v3545_v62  ;;  %451 = vst.msk [vmem:[#allocation3 + $0xd8] sm:$0xff] %vm391_vm1, %v3545_v62 }
 0x141   : > { %v3798_v48 = vpop.f32.mrb[13].mxu0  ;;  %v3800_v49 = vpop.f32.mrb[12].mxu1  ;;  %452 = vst.msk [vmem:[#allocation3 + $0xe0] sm:$0xff] %vm391_vm1, %v3545_v62  ;;  %453 = vst.msk [vmem:[#allocation3 + $0xe8] sm:$0xff] %vm391_vm1, %v3545_v62  ;;  %v4007_v31 = vadd.f32 %v3793_v45, %v2993_v26 }
 0x142   : > { %v3805_v52 = vpop.f32.mrb[14].mxu0  ;;  %v3807_v53 = vpop.f32.mrb[13].mxu1  ;;  %454 = vst.msk [vmem:[#allocation3 + $0xf0] sm:$0xff] %vm391_vm1, %v3545_v62  ;;  %455 = vst.msk [vmem:[#allocation3 + $0xf8] sm:$0xff] %vm391_vm1, %v3545_v62  ;;  %v4016_v38 = vadd.f32 %v3800_v49, %v3025_v33  ;;  %v4025_v43 = vadd.f32 %v2989_v37, %v3798_v48  ;;  %v4038_v49 = vld [vmem:[#allocation2 + $0x10] sm:$0xff]  ;;  %v4092_v33 = vld [vmem:[#allocation2 + $0x8] sm:$0xff]  ;;  %3173 = vmatpush3.bf16.msra.mxu0 %v3314_v19 }
 0x143   : > { %1110 = vmax.xlane.f32.xlu1 %v3795_v46  ;;  %v3811_v56 = vpop.f32.mrb[14].mxu1  ;;  %v3813_v57 = vpop.f32.mrb[15].mxu0  ;;  %458 = vst.msk [vmem:[#allocation4 + $0x8] sm:$0xff] %vm456_vm0, %v3545_v62  ;;  %459 = vst.msk [vmem:[#allocation4 + $0x10] sm:$0xff] %vm456_vm0, %v3545_v62  ;;  %v4004_v29 = vadd.f32 %v3805_v52, %v2994_v21  ;;  %v4033_v47 = vadd.f32 %v3021_v44, %v3807_v53  ;;  %v4040_v48 = vld [vmem:[#allocation2 + $0x90] sm:$0xff]  ;;  %v4048_v52 = vld [vmem:[#allocation2 + $0x18] sm:$0xff] }
 0x144   : > { %1108 = vmax.xlane.f32.xlu0 %v3802_v50  ;;  %v3820_v61 = vpop.f32.mrb[15].mxu1  ;;  %460 = vst.msk [vmem:[#allocation4 + $0x18] sm:$0xff] %vm456_vm0, %v3545_v62  ;;  %461 = vst.msk [vmem:[#allocation4 + $0x20] sm:$0xff] %vm456_vm0, %v3545_v62  ;;  %v4013_v34 = vadd.f32 %v3811_v56, %v3026_v30  ;;  %v4022_v41 = vadd.f32 %v2990_v36, %v3813_v57  ;;  %v3311_v53 = vld [vmem:[%s4046_s6 + $0x40] sm:$0xff]   ;;  %v3315_v21 = vld [vmem:[%s4046_s6 + $0x50] sm:$0xff]  }
 0x145   : > { %462 = vst.msk [vmem:[#allocation4 + $0x28] sm:$0xff] %vm456_vm0, %v3545_v62  ;;  %463 = vst.msk [vmem:[#allocation4 + $0x30] sm:$0xff] %vm456_vm0, %v3545_v62  ;;  %v4030_v45 = vadd.f32 %v3022_v42, %v3820_v61  ;;  %v4054_v57 = vld [vmem:[#allocation2] sm:$0xff]  ;;  %3202 = vmatprep.subr.bf16.mxu1 %v3311_v53  ;;  %v4087_v30 = vld [vmem:[#allocation2 + $0x88] sm:$0xff] }
 0x146   : > { %464 = vst.msk [vmem:[#allocation4 + $0x38] sm:$0xff] %vm456_vm0, %v3545_v62  ;;  %465 = vst.msk [vmem:[#allocation4 + $0x40] sm:$0xff] %vm456_vm0, %v3545_v62  ;;  %3203 = vmatpush3.bf16.msra.mxu1 %v3311_v53  ;;  %v3316_v44 = vld [vmem:[%s4046_s6 + $0x10] sm:$0xff]   ;;  %v3318_v19 = vld [vmem:[%s4046_s6 + $0x18] sm:$0xff]  }
 0x147   : > { %466 = vst.msk [vmem:[#allocation4 + $0x48] sm:$0xff] %vm456_vm0, %v3545_v62  ;;  %467 = vst.msk [vmem:[#allocation4 + $0x50] sm:$0xff] %vm456_vm0, %v3545_v62  ;;  %1142 = vmax.xlane.f32.xlu1 %v3953_v63  ;;  %3204 = vmatprep.subr.bf16.mxu1 %v3313_v6  ;;  %v4146_v36 = vld [vmem:[#allocation2 + $0x28] sm:$0xff]  ;;  %v4265_v50 = vld [vmem:[#allocation2 + $0xf8] sm:$0xff] }
 0x148   : > { %468 = vst.msk [vmem:[#allocation4 + $0x58] sm:$0xff] %vm456_vm0, %v3545_v62  ;;  %469 = vst.msk [vmem:[#allocation4 + $0x60] sm:$0xff] %vm456_vm0, %v3545_v62  ;;  %1140 = vmax.xlane.f32.xlu0 %v3958_v0  ;;  %3174 = vmatprep.subr.bf16.mxu0 %v3316_v44 }
 0x149   : > { %470 = vst.msk [vmem:[#allocation4 + $0x68] sm:$0xff] %vm456_vm0, %v3545_v62  ;;  %471 = vst.msk [vmem:[#allocation4 + $0x70] sm:$0xff] %vm456_vm0, %v3545_v62  ;;  %3175 = vmatpush3.bf16.msra.mxu0 %v3316_v44 }
 0x14a   : > { %472 = vst.msk [vmem:[#allocation4 + $0x78] sm:$0xff] %vm456_vm0, %v3545_v62  ;;  %473 = vst.msk [vmem:[#allocation4 + $0x80] sm:$0xff] %vm456_vm0, %v3545_v62  ;;  %3205 = vmatpush3.bf16.msra.mxu1 %v3313_v6  ;;  %3176 = vmatprep.subr.bf16.mxu0 %v3318_v19 }
 0x14b   : > { %474 = vst.msk [vmem:[#allocation4 + $0x88] sm:$0xff] %vm456_vm0, %v3545_v62  ;;  %475 = vst.msk [vmem:[#allocation4 + $0x90] sm:$0xff] %vm456_vm0, %v3545_v62  ;;  %1122 = vmax.xlane.f32.xlu1 %v3964_v1  ;;  %3206 = vmatprep.subr.bf16.mxu1 %v3315_v21 }
 0x14c   : > { %476 = vst.msk [vmem:[#allocation4 + $0x98] sm:$0xff] %vm456_vm0, %v3545_v62  ;;  %477 = vst.msk [vmem:[#allocation4 + $0xa0] sm:$0xff] %vm456_vm0, %v3545_v62  ;;  %1120 = vmax.xlane.f32.xlu0 %v3971_v4 }
 0x14d   : > { %478 = vst.msk [vmem:[#allocation4 + $0xa8] sm:$0xff] %vm456_vm0, %v3545_v62  ;;  %479 = vst.msk [vmem:[#allocation4 + $0xb0] sm:$0xff] %vm456_vm0, %v3545_v62  ;;  %3177 = vmatpush3.bf16.msra.mxu0 %v3318_v19  ;;  %v4166_v19 = vld [vmem:[#allocation2 + $0xa8] sm:$0xff] }
 0x14e   : > { %480 = vst.msk [vmem:[#allocation4 + $0xb8] sm:$0xff] %vm456_vm0, %v3545_v62  ;;  %481 = vst.msk [vmem:[#allocation4 + $0xc0] sm:$0xff] %vm456_vm0, %v3545_v62  ;;  %3207 = vmatpush3.bf16.msra.mxu1 %v3315_v21  ;;  %v3319_v21 = vld [vmem:[%s4046_s6 + $0x60] sm:$0xff]  }
 0x14f   : > { %482 = vst.msk [vmem:[#allocation4 + $0xc8] sm:$0xff] %vm456_vm0, %v3545_v62  ;;  %483 = vst.msk [vmem:[#allocation4 + $0xd0] sm:$0xff] %vm456_vm0, %v3545_v62  ;;  %1154 = vmax.xlane.f32.xlu1 %v3977_v8 }
 0x150   : > { %484 = vst.msk [vmem:[#allocation4 + $0xd8] sm:$0xff] %vm456_vm0, %v3545_v62  ;;  %485 = vst.msk [vmem:[#allocation4 + $0xe0] sm:$0xff] %vm456_vm0, %v3545_v62  ;;  %1152 = vmax.xlane.f32.xlu0 %v3980_v12 }
 0x151   : > { %486 = vst.msk [vmem:[#allocation4 + $0xe8] sm:$0xff] %vm456_vm0, %v3545_v62  ;;  %487 = vst.msk [vmem:[#allocation4 + $0xf0] sm:$0xff] %vm456_vm0, %v3545_v62 }
 0x152   : > { %488 = vst.msk [vmem:[#allocation4 + $0xf8] sm:$0xff] %vm456_vm0, %v3545_v62  ;;  %4851 = vst [vmem:[#allocation18_spill] sm:$0xff] %v3953_v63  ;;  %v4273_v63 = vld [vmem:[#allocation2 + $0xf0] sm:$0xff] }
 0x153   : > { %4852 = vst [vmem:[#allocation19_spill] sm:$0xff] %v3958_v0  ;;  %4853 = vst [vmem:[#allocation20_spill] sm:$0xff] %v3964_v1  ;;  %1118 = vmax.xlane.f32.xlu1 %v3986_v15  ;;  %v4234_v1 = vld [vmem:[#allocation2 + $0xc8] sm:$0xff]  ;;  %v4257_v0 = vld [vmem:[#allocation2 + $0x70] sm:$0xff] }
 0x154   : > { %4854 = vst [vmem:[#allocation21_spill] sm:$0xff] %v3971_v4  ;;  %4855 = vst [vmem:[#allocation22_spill] sm:$0xff] %v3977_v8  ;;  %1116 = vmax.xlane.f32.xlu0 %v3989_v17  ;;  %v4207_v8 = vld [vmem:[#allocation2 + $0xd0] sm:$0xff] }
 0x155   : > { %4856 = vst [vmem:[#allocation23_spill] sm:$0xff] %v3980_v12  ;;  %4857 = vst [vmem:[#allocation24_spill] sm:$0xff] %v3986_v15  ;;  %v4239_v12 = vld [vmem:[#allocation2 + $0xc0] sm:$0xff] }
 0x156   : > { %4858 = vst [vmem:[#allocation25_spill] sm:$0xff] %v3989_v17  ;;  %4859 = vst [vmem:[#allocation26_spill] sm:$0xff] %v3995_v20  ;;  %v4223_v17 = vld [vmem:[#allocation2 + $0x40] sm:$0xff] }
 0x157   : > { %4860 = vst [vmem:[#allocation27_spill] sm:$0xff] %v3998_v22  ;;  %1150 = vmax.xlane.f32.xlu1 %v3995_v20  ;;  %4861 = vst [vmem:[#allocation28_spill] sm:$0xff] %v4004_v29 }
 0x158   : > { %4862 = vst [vmem:[#allocation29_spill] sm:$0xff] %v4007_v31  ;;  %1148 = vmax.xlane.f32.xlu0 %v3998_v22  ;;  %4863 = vst [vmem:[#allocation30_spill] sm:$0xff] %v4013_v34  ;;  %v4202_v22 = vld [vmem:[#allocation2 + $0xd8] sm:$0xff] }
 0x159   : > { %4864 = vst [vmem:[#allocation31_spill] sm:$0xff] %v4016_v38  ;;  %4865 = vst [vmem:[#allocation32_spill] sm:$0xff] %v4022_v41 }
 0x15a   : > { %4866 = vst [vmem:[#allocation33_spill] sm:$0xff] %v4025_v43  ;;  %4867 = vst [vmem:[#allocation34_spill] sm:$0xff] %v4030_v45 }
 0x15b   : > { %1130 = vmax.xlane.f32.xlu1 %v4004_v29  ;;  %4868 = vst [vmem:[#allocation35_spill] sm:$0xff] %v4033_v47  ;;  %v4183_v29 = vld [vmem:[#allocation2 + $0x58] sm:$0xff] }
 0x15c   : > { %1128 = vmax.xlane.f32.xlu0 %v4007_v31 }
 0x15f   : > { %1162 = vmax.xlane.f32.xlu1 %v4013_v34  ;;  %v4170_v34 = vld [vmem:[#allocation2 + $0xa0] sm:$0xff] }
 0x160   : > { %1160 = vmax.xlane.f32.xlu0 %v4016_v38  ;;  %v4188_v38 = vld [vmem:[#allocation2 + $0x50] sm:$0xff] }
 0x163   : > { %1126 = vmax.xlane.f32.xlu1 %v4022_v41 }
 0x164   : > { %1124 = vmax.xlane.f32.xlu0 %v4025_v43  ;;  %v3325_v43 = vld [vmem:[%s4046_s6 + $0x78] sm:$0xff]  }
 0x167   : > { %1158 = vmax.xlane.f32.xlu1 %v4030_v45 }
 0x168   : > { %1156 = vmax.xlane.f32.xlu0 %v4033_v47 }
 0x1b8   : > { %v1105_v51 = vpop.xlane.xlu1 %1104 }
 0x1b9   : > { %v1137_v54 = vpop.xlane.xlu0 %1136  ;;  %v4052_v56 = vmax.f32 %v4038_v49, %v1105_v51  ;;  %v3317_v51 = vld [vmem:[%s4046_s6 + $0x58] sm:$0xff]  }
 0x1ba   : > { %v4057_v58 = vmax.f32 %v4040_v48, %v1137_v54  ;;  %v4110_v54 = vld [vmem:[#allocation2 + $0x38] sm:$0xff]  ;;  %3208 = vmatprep.subr.bf16.mxu1 %v3317_v51 }
 0x1bb   : > { %2369 = vst.msk [vmem:[#allocation2 + $0x10] sm:$0xff] %vm391_vm1, %v4052_v56  ;;  %1304 = vperm.xlu1 %3277, %v4052_v56   ;;  %3209 = vmatpush3.bf16.msra.mxu1 %v3317_v51 }
 0x1bc   : > { %2385 = vst.msk [vmem:[#allocation2 + $0x90] sm:$0xff] %vm391_vm1, %v4057_v58  ;;  %v1107_v62 = vpop.xlane.xlu1 %1106  ;;  %3210 = vmatprep.subr.bf16.mxu1 %v3319_v21 }
 0x1bd   : > { %v4071_v7 = vmax.f32 %v4048_v52, %v1107_v62  ;;  %v1101_v10 = vpop.xlane.xlu0 %1100  ;;  %v4114_v62 = vld [vmem:[#allocation2 + $0x30] sm:$0xff] }
 0x1be   : > { %v1164_v14 = vmax.f32 %v4054_v57, %v1101_v10 }
 0x1bf   : > { %2370 = vst.msk [vmem:[#allocation2 + $0x18] sm:$0xff] %vm391_vm1, %v4071_v7  ;;  %1384 = vperm.xlu1 %3277, %v4057_v58   ;;  %3211 = vmatpush3.bf16.msra.mxu1 %v3319_v21  ;;  %v1199_v39 = vsub.f32 %v4048_v52, %v4071_v7  ;;  %v4291_v52 = vld [vmem:[#allocation2 + $0x60] sm:$0xff] }
 0x1c0   : > { %2367 = vst.msk [vmem:[#allocation2] sm:$0xff] %vm391_vm1, %v1164_v14  ;;  %1294 = vperm.xlu0 %3278, %v1164_v14   ;;  %v1139_v18 = vpop.xlane.xlu1 %1138  ;;  %v1196_v2 = vsub.f32 %v4054_v57, %v1164_v14  ;;  %v4129_v14 = vld [vmem:[#allocation2 + $0xb8] sm:$0xff] }
 0x1c1   : > { %v4085_v26 = vmax.f32 %v4073_v11, %v1139_v18  ;;  %v1133_v28 = vpop.xlane.xlu0 %1132 }
 0x1c2   : > { %v4090_v32 = vmax.f32 %v4076_v16, %v1133_v28  ;;  %v4133_v28 = vld [vmem:[#allocation2 + $0xb0] sm:$0xff] }
 0x1c3   : > { %2386 = vst.msk [vmem:[#allocation2 + $0x98] sm:$0xff] %vm391_vm1, %v4085_v26 }
 0x1c4   : > { %2383 = vst.msk [vmem:[#allocation2 + $0x80] sm:$0xff] %vm391_vm1, %v4090_v32  ;;  %1389 = vperm.xlu0 %3278, %v4085_v26   ;;  %1374 = vperm.xlu1 %3277, %v4090_v32   ;;  %v1135_v37 = vpop.xlane.xlu1 %1134 }
 0x1c5   : > { %v4103_v40 = vmax.f32 %v4087_v30, %v1135_v37  ;;  %v1103_v42 = vpop.xlane.xlu0 %1102  ;;  %v1228_v37 = vmul.f32 1.442695, %v1196_v2  ;;  %v4151_v2 = vld [vmem:[#allocation2 + $0x20] sm:$0xff] }
 0x1c6   : > { %v4108_v53 = vmax.f32 %v4092_v33, %v1103_v42 }
 0x1c7   : > { %2384 = vst.msk [vmem:[#allocation2 + $0x88] sm:$0xff] %vm391_vm1, %v4103_v40  ;;  %3327 = vpow2.f32 %v1228_v37  ;;  %v3323_v37 = vld [vmem:[%s4046_s6 + $0x70] sm:$0xff]  }
 0x1c8   : > { %2368 = vst.msk [vmem:[#allocation2 + $0x8] sm:$0xff] %vm391_vm1, %v4108_v53  ;;  %1379 = vperm.xlu0 %3278, %v4103_v40   ;;  %1309 = vperm.xlu1 %3277, %v4071_v7   ;;  %v1115_v6 = vpop.xlane.xlu1 %1114  ;;  %v1197_v15 = vsub.f32 %v4092_v33, %v4108_v53  ;;  %v1234_v7 = vmul.f32 1.442695, %v1199_v39  ;;  %v4309_v39 = vld [vmem:[#allocation2 + $0xe0] sm:$0xff] }
 0x1c9   : > { %v4122_v10 = vmax.f32 %v4110_v54, %v1115_v6  ;;  %v1113_v18 = vpop.xlane.xlu0 %1112  ;;  %v3320_v6 = vld [vmem:[%s4046_s6 + $0x20] sm:$0xff]  }
 0x1ca   : > { %v4127_v57 = vmax.f32 %v4114_v62, %v1113_v18  ;;  %v3321_v18 = vld [vmem:[%s4046_s6 + $0x68] sm:$0xff]   ;;  %3178 = vmatprep.subr.bf16.mxu0 %v3320_v6 }
 0x1cb   : > { %2374 = vst.msk [vmem:[#allocation2 + $0x38] sm:$0xff] %vm391_vm1, %v4122_v10  ;;  %3212 = vmatprep.subr.bf16.mxu1 %v3321_v18  ;;  %3179 = vmatpush3.bf16.msra.mxu0 %v3320_v6 }
 0x1cc   : > { %2373 = vst.msk [vmem:[#allocation2 + $0x30] sm:$0xff] %vm391_vm1, %v4127_v57  ;;  %1299 = vperm.xlu1 %3277, %v4108_v53   ;;  %v1147_v42 = vpop.xlane.xlu1 %1146  ;;  %3213 = vmatpush3.bf16.msra.mxu1 %v3321_v18  ;;  %v1230_v53 = vmul.f32 1.442695, %v1197_v15 }
 0x1cd   : > { %v4139_v44 = vmax.f32 %v4129_v14, %v1147_v42  ;;  %v1145_v51 = vpop.xlane.xlu0 %1144  ;;  %3180 = vmatprep.subr.bf16.mxu0 %v3322_v60  ;;  %3214 = vmatprep.subr.bf16.mxu1 %v3323_v37 }
 0x1ce   : > { %v4144_v61 = vmax.f32 %v4133_v28, %v1145_v51  ;;  %3329 = vpow2.f32 %v1230_v53 }
 0x1cf   : > { %2390 = vst.msk [vmem:[#allocation2 + $0xb8] sm:$0xff] %vm391_vm1, %v4139_v44  ;;  %1409 = vperm.xlu0 %3278, %v4139_v44   ;;  %3181 = vmatpush3.bf16.msra.mxu0 %v3322_v60  ;;  %3331 = vpow2.f32 %v1234_v7 }
 0x1d0   : > { %2389 = vst.msk [vmem:[#allocation2 + $0xb0] sm:$0xff] %vm391_vm1, %v4144_v61  ;;  %1324 = vperm.xlu1 %3277, %v4127_v57   ;;  %v1111_v21 = vpop.xlane.xlu1 %1110  ;;  %3215 = vmatpush3.bf16.msra.mxu1 %v3323_v37 }
 0x1d1   : > { %v4159_v42 = vmax.f32 %v4146_v36, %v1111_v21  ;;  %v1109_v51 = vpop.xlane.xlu0 %1108  ;;  %3216 = vmatprep.subr.bf16.mxu1 %v3325_v43  ;;  %v4197_v41 = vpop.eup %3327 }
 0x1d2   : > { %v4164_v47 = vmax.f32 %v4151_v2, %v1109_v51  ;;  %v3324_v51 = vld [vmem:[%s4046_s6 + $0x30] sm:$0xff]   ;;  %4869 = vst [vmem:[#allocation36_spill] sm:$0xff] %v4197_v41 }
 0x1d3   : > { %2372 = vst.msk [vmem:[#allocation2 + $0x28] sm:$0xff] %vm391_vm1, %v4159_v42  ;;  %3182 = vmatprep.subr.bf16.mxu0 %v3324_v51  ;;  %v1201_v53 = vsub.f32 %v4146_v36, %v4159_v42  ;;  %v1203_v36 = vsub.f32 %v4110_v54, %v4122_v10  ;;  %v1213_v54 = vsub.f32 %v4087_v30, %v4103_v40 }
 0x1d4   : > { %2371 = vst.msk [vmem:[#allocation2 + $0x20] sm:$0xff] %vm391_vm1, %v4164_v47  ;;  %1404 = vperm.xlu1 %3277, %v4144_v61   ;;  %v1143_v6 = vpop.xlane.xlu1 %1142  ;;  %3183 = vmatpush3.bf16.msra.mxu0 %v3324_v51  ;;  %v1200_v40 = vsub.f32 %v4151_v2, %v4164_v47 }
 0x1d5   : > { %v4176_v18 = vmax.f32 %v4166_v19, %v1143_v6  ;;  %v1141_v21 = vpop.xlane.xlu0 %1140  ;;  %3217 = vmatpush3.bf16.msra.mxu1 %v3325_v43  ;;  %v1262_v7 = vmul.f32 1.442695, %v1213_v54 }
 0x1d6   : > { %v4181_v45 = vmax.f32 %v4170_v34, %v1141_v21  ;;  %v3326_v21 = vld [vmem:[%s4046_s6 + $0x38] sm:$0xff]  }
 0x1d7   : > { %2388 = vst.msk [vmem:[#allocation2 + $0xa8] sm:$0xff] %vm391_vm1, %v4176_v18  ;;  %1399 = vperm.xlu0 %3278, %v4176_v18   ;;  %3184 = vmatprep.subr.bf16.mxu0 %v3326_v21 }
 0x1d8   : > { %2387 = vst.msk [vmem:[#allocation2 + $0xa0] sm:$0xff] %vm391_vm1, %v4181_v45  ;;  %1314 = vperm.xlu1 %3277, %v4164_v47   ;;  %v1123_v60 = vpop.xlane.xlu1 %1122  ;;  %3185 = vmatpush3.bf16.msra.mxu0 %v3326_v21  ;;  %v4322_v59 = vpop.eup %3329  ;;  %v1219_v47 = vsub.f32 %v4129_v14, %v4139_v44 }
 0x1d9   : > { %v4194_v37 = vmax.f32 %v4183_v29, %v1123_v60  ;;  %v1121_v6 = vpop.xlane.xlu0 %1120 }
 0x1da   : > { %v4200_v31 = vmax.f32 %v4188_v38, %v1121_v6 }
 0x1db   : > { %1775 = vperm.xlu0 %3278, %v4197_v41   ;;  %2378 = vst.msk [vmem:[#allocation2 + $0x58] sm:$0xff] %vm391_vm1, %v4194_v37  ;;  %v4218_v41 = vld [vmem:[#allocation2 + $0x48] sm:$0xff] }
 0x1dc   : > { %1394 = vperm.xlu1 %3277, %v4181_v45   ;;  %2377 = vst.msk [vmem:[#allocation2 + $0x50] sm:$0xff] %vm391_vm1, %v4200_v31  ;;  %v1155_v43 = vpop.xlane.xlu1 %1154 }
 0x1dd   : > { %v4213_v51 = vmax.f32 %v4202_v22, %v1155_v43  ;;  %v1153_v60 = vpop.xlane.xlu0 %1152 }
 0x1de   : > { %v4216_v6 = vmax.f32 %v4207_v8, %v1153_v60 }
 0x1df   : > { %1349 = vperm.xlu0 %3278, %v4194_v37   ;;  %2394 = vst.msk [vmem:[#allocation2 + $0xd8] sm:$0xff] %vm391_vm1, %v4213_v51 }
 0x1e0   : > { %1329 = vperm.xlu1 %3277, %v4122_v10   ;;  %2393 = vst.msk [vmem:[#allocation2 + $0xd0] sm:$0xff] %vm391_vm1, %v4216_v6  ;;  %v1119_v43 = vpop.xlane.xlu1 %1118  ;;  %v1242_v10 = vmul.f32 1.442695, %v1203_v36  ;;  %v4341_v36 = vpop.eup %3331 }
 0x1e1   : > { %v4229_v21 = vmax.f32 %v4218_v41, %v1119_v43  ;;  %v1117_v60 = vpop.xlane.xlu0 %1116 }
 0x1e2   : > { %v4232_v20 = vmax.f32 %v4223_v17, %v1117_v60 }
 0x1e3   : > { %1429 = vperm.xlu0 %3278, %v4213_v51   ;;  %2376 = vst.msk [vmem:[#allocation2 + $0x48] sm:$0xff] %vm391_vm1, %v4229_v21 }
 0x1e4   : > { %1319 = vperm.xlu1 %3277, %v4159_v42   ;;  %2375 = vst.msk [vmem:[#allocation2 + $0x40] sm:$0xff] %vm391_vm1, %v4232_v20  ;;  %v1151_v43 = vpop.xlane.xlu1 %1150  ;;  %v1238_v42 = vmul.f32 1.442695, %v1201_v53  ;;  %v4870_v53 = vsub.f32 %v4038_v49, %v4052_v56  ;;  %v1236_v49 = vmul.f32 1.442695, %v1200_v40 }
 0x1e5   : > { %v4247_v60 = vmax.f32 %v4234_v1, %v1151_v43  ;;  %v1149_v4 = vpop.xlane.xlu0 %1148 }
 0x1e6   : > { %v4250_v46 = vmax.f32 %v4239_v12, %v1149_v4  ;;  %3333 = vpow2.f32 %v1238_v42  ;;  %v1232_v30 = vmul.f32 1.442695, %v4870_v53 }
 0x1e7   : > { %1339 = vperm.xlu0 %3278, %v4229_v21   ;;  %2392 = vst.msk [vmem:[#allocation2 + $0xc8] sm:$0xff] %vm391_vm1, %v4247_v60  ;;  %3335 = vpow2.f32 %v1242_v10 }
 0x1e8   : > { %1344 = vperm.xlu1 %3277, %v4200_v31   ;;  %2391 = vst.msk [vmem:[#allocation2 + $0xc0] sm:$0xff] %vm391_vm1, %v4250_v46  ;;  %v1131_v33 = vpop.xlane.xlu1 %1130  ;;  %3337 = vpow2.f32 %v1262_v7 }
 0x1e9   : > { %v4263_v43 = vmax.f32 %v4252_v25, %v1131_v33  ;;  %v1129_v4 = vpop.xlane.xlu0 %1128  ;;  %3339 = vpow2.f32 %v1232_v30  ;;  %v1206_v30 = vsub.f32 %v4188_v38, %v4200_v31 }
 0x1ea   : > { %v4268_v35 = vmax.f32 %v4257_v0, %v1129_v4 }
 0x1eb   : > { %1419 = vperm.xlu0 %3278, %v4247_v60   ;;  %2382 = vst.msk [vmem:[#allocation2 + $0x78] sm:$0xff] %vm391_vm1, %v4263_v43 }
 0x1ec   : > { %1424 = vperm.xlu1 %3277, %v4216_v6   ;;  %v1163_v15 = vpop.xlane.xlu1 %1162  ;;  %2381 = vst.msk [vmem:[#allocation2 + $0x70] sm:$0xff] %vm391_vm1, %v4268_v35 }
 0x1ed   : > { %v4281_v33 = vmax.f32 %v4265_v50, %v1163_v15  ;;  %v1161_v4 = vpop.xlane.xlu0 %1160 }
 0x1ee   : > { %v4286_v24 = vmax.f32 %v4273_v63, %v1161_v4 }
 0x1ef   : > { %1369 = vperm.xlu0 %3278, %v4263_v43   ;;  %2398 = vst.msk [vmem:[#allocation2 + $0xf8] sm:$0xff] %vm391_vm1, %v4281_v33 }
 0x1f0   : > { %1334 = vperm.xlu1 %3277, %v4232_v20   ;;  %v1127_v15 = vpop.xlane.xlu1 %1126  ;;  %2397 = vst.msk [vmem:[#allocation2 + $0xf0] sm:$0xff] %vm391_vm1, %v4286_v24  ;;  %v4349_v56 = vpop.eup %3333 }
 0x1f1   : > { %v4299_v4 = vmax.f32 %v4283_v27, %v1127_v15  ;;  %v1125_v23 = vpop.xlane.xlu0 %1124 }
 0x1f2   : > { %v4304_v5 = vmax.f32 %v4291_v52, %v1125_v23 }
 0x1f3   : > { %1449 = vperm.xlu0 %3278, %v4281_v33   ;;  %2380 = vst.msk [vmem:[#allocation2 + $0x68] sm:$0xff] %vm391_vm1, %v4299_v4 }
 0x1f4   : > { %1414 = vperm.xlu1 %3277, %v4250_v46   ;;  %v1159_v15 = vpop.xlane.xlu1 %1158  ;;  %2379 = vst.msk [vmem:[#allocation2 + $0x60] sm:$0xff] %vm391_vm1, %v4304_v5 }
 0x1f5   : > { %v4317_v23 = vmax.f32 %v4301_v3, %v1159_v15  ;;  %v1157_v9 = vpop.xlane.xlu0 %1156 }
 0x1f6   : > { %v4320_v13 = vmax.f32 %v4309_v39, %v1157_v9  ;;  %v1215_v9 = vsub.f32 %v4073_v11, %v4085_v26  ;;  %v1217_v11 = vsub.f32 %v4166_v19, %v4176_v18  ;;  %v1202_v26 = vsub.f32 %v4114_v62, %v4127_v57  ;;  %v4355_v19 = vpop.eup %3335 }
 0x1f7   : > { %1359 = vperm.xlu0 %3278, %v4299_v4   ;;  %2396 = vst.msk [vmem:[#allocation2 + $0xe8] sm:$0xff] %vm391_vm1, %v4317_v23  ;;  %v1274_v18 = vmul.f32 1.442695, %v1219_v47  ;;  %v1207_v62 = vsub.f32 %v4183_v29, %v4194_v37  ;;  %v4871_v57 = vsub.f32 %v4076_v16, %v4090_v32  ;;  %v4364_v44 = vpop.eup %3337  ;;  %v4872_v29 = vsub.f32 %v4040_v48, %v4057_v58 }
 0x1f8   : > { %1780 = vperm.xlu1 %3277, %v4322_v59   ;;  %2395 = vst.msk [vmem:[#allocation2 + $0xe0] sm:$0xff] %vm391_vm1, %v4320_v13  ;;  %v1266_v42 = vmul.f32 1.442695, %v1215_v9  ;;  %v1270_v2 = vmul.f32 1.442695, %v1217_v11  ;;  %v4366_v54 = vpop.eup %3339  ;;  %v1223_v9 = vsub.f32 %v4202_v22, %v4213_v51  ;;  %v1216_v16 = vsub.f32 %v4170_v34, %v4181_v45 }
 0x1f9   : > { %v1240_v15 = vmul.f32 1.442695, %v1202_v26  ;;  %v1260_v14 = vmul.f32 1.442695, %v4871_v57  ;;  %v1250_v10 = vmul.f32 1.442695, %v1207_v62  ;;  %v1205_v22 = vsub.f32 %v4218_v41, %v4229_v21 }
 0x1fa   : > { %3341 = vpow2.f32 %v1266_v42  ;;  %v1264_v37 = vmul.f32 1.442695, %v4872_v29  ;;  %v1282_v53 = vmul.f32 1.442695, %v1223_v9  ;;  %v1268_v48 = vmul.f32 1.442695, %v1216_v16 }
 0x1fb   : > { %1439 = vperm.xlu0 %3278, %v4317_v23   ;;  %3343 = vpow2.f32 %v1236_v49  ;;  %v1246_v34 = vmul.f32 1.442695, %v1205_v22  ;;  %v1221_v45 = vsub.f32 %v4234_v1, %v4247_v60  ;;  %v4873_v41 = vsub.f32 %v4133_v28, %v4144_v61 }
 0x1fc   : > { %1364 = vperm.xlu1 %3277, %v4268_v35   ;;  %3345 = vpow2.f32 %v1270_v2  ;;  %v1211_v1 = vsub.f32 %v4252_v25, %v4263_v43  ;;  %v1248_v61 = vmul.f32 1.442695, %v1206_v30  ;;  %v1222_v28 = vsub.f32 %v4207_v8, %v4216_v6 }
 0x1fd   : > { %3347 = vpow2.f32 %v1240_v15  ;;  %v1272_v21 = vmul.f32 1.442695, %v4873_v41  ;;  %v1278_v11 = vmul.f32 1.442695, %v1221_v45  ;;  %v1227_v26 = vsub.f32 %v4265_v50, %v4281_v33 }
 0x1fe   : > { %3349 = vpow2.f32 %v1274_v18  ;;  %v1258_v38 = vmul.f32 1.442695, %v1211_v1  ;;  %v1280_v25 = vmul.f32 1.442695, %v1222_v28  ;;  %v1204_v43 = vsub.f32 %v4223_v17, %v4232_v20 }
 0x1ff   : > { %1790 = vperm.xlu0 %3278, %v4341_v36   ;;  %3351 = vpow2.f32 %v1260_v14  ;;  %v1290_v6 = vmul.f32 1.442695, %v1227_v26  ;;  %v1209_v47 = vsub.f32 %v4283_v27, %v4299_v4  ;;  %v1220_v33 = vsub.f32 %v4239_v12, %v4250_v46 }
 0x200   : > { %1444 = vperm.xlu1 %3277, %v4286_v24   ;;  %3353 = vpow2.f32 %v1250_v10  ;;  %v1244_v50 = vmul.f32 1.442695, %v1204_v43  ;;  %v1225_v15 = vsub.f32 %v4301_v3, %v4317_v23  ;;  %v1210_v4 = vsub.f32 %v4257_v0, %v4268_v35 }
 0x201   : > { %3355 = vpow2.f32 %v1264_v37  ;;  %v1254_v20 = vmul.f32 1.442695, %v1209_v47  ;;  %v1276_v27 = vmul.f32 1.442695, %v1220_v33  ;;  %v1226_v3 = vsub.f32 %v4273_v63, %v4286_v24  ;;  %v4878_v33 = vld [vmem:[#allocation6_spill] sm:$0xff] }
 0x202   : > { %3357 = vpow2.f32 %v1282_v53  ;;  %v1286_v12 = vmul.f32 1.442695, %v1225_v15  ;;  %v1256_v62 = vmul.f32 1.442695, %v1210_v4  ;;  %v1208_v0 = vsub.f32 %v4291_v52, %v4304_v5  ;;  %v4879_v15 = vld [vmem:[#allocation10_spill] sm:$0xff] }
 0x203   : > { %1800 = vperm.xlu0 %3278, %v4349_v56   ;;  %3359 = vpow2.f32 %v1268_v48  ;;  %v1288_v35 = vmul.f32 1.442695, %v1226_v3  ;;  %v1224_v63 = vsub.f32 %v4309_v39, %v4320_v13 }
 0x204   : > { %1354 = vperm.xlu1 %3277, %v4304_v5   ;;  %v4377_v32 = vpop.eup %3341  ;;  %3361 = vpow2.f32 %v1246_v34  ;;  %v1252_v24 = vmul.f32 1.442695, %v1208_v0  ;;  %v4874_v34 = vld [vmem:[#allocation5_spill] sm:$0xff] }
 0x205   : > { %v4379_v7 = vpop.eup %3343  ;;  %3363 = vpow2.f32 %v1272_v21  ;;  %v1284_v5 = vmul.f32 1.442695, %v1224_v63 }
 0x206   : > { %v4385_v58 = vpop.eup %3345  ;;  %3365 = vpow2.f32 %v1278_v11  ;;  %v4875_v11 = vld [vmem:[#allocation9_spill] sm:$0xff] }
 0x207   : > { %1810 = vperm.xlu0 %3278, %v4355_v19   ;;  %v4387_v51 = vpop.eup %3347  ;;  %3367 = vpow2.f32 %v1248_v61  ;;  %v4876_v61 = vld [vmem:[#allocation8_spill] sm:$0xff] }
 0x208   : > { %1434 = vperm.xlu1 %3277, %v4320_v13   ;;  %v4398_v40 = vpop.eup %3349  ;;  %3369 = vpow2.f32 %v1258_v38 }
 0x209   : > { %v4400_v42 = vpop.eup %3351  ;;  %3371 = vpow2.f32 %v1280_v25  ;;  %v4877_v25 = vld [vmem:[#allocation7_spill] sm:$0xff] }
 0x20a   : > { %v4408_v60 = vpop.eup %3353  ;;  %3373 = vpow2.f32 %v1290_v6 }
 0x20b   : > { %1860 = vperm.xlu0 %3278, %v4364_v44   ;;  %v4410_v31 = vpop.eup %3355  ;;  %3375 = vpow2.f32 %v1244_v50 }
 0x20c   : > { %1785 = vperm.xlu1 %3277, %v4366_v54   ;;  %v4418_v49 = vpop.eup %3357  ;;  %3377 = vpow2.f32 %v1254_v20 }
 0x20d   : > { %v4420_v8 = vpop.eup %3359  ;;  %3379 = vpow2.f32 %v1276_v27 }
 0x20e   : > { %v4428_v2 = vpop.eup %3361  ;;  %3381 = vpow2.f32 %v1286_v12 }
 0x20f   : > { %1870 = vperm.xlu0 %3278, %v4377_v32   ;;  %v4430_v17 = vpop.eup %3363  ;;  %3383 = vpow2.f32 %v1256_v62 }
 0x210   : > { %1795 = vperm.xlu1 %3277, %v4379_v7   ;;  %v4438_v18 = vpop.eup %3365  ;;  %3385 = vpow2.f32 %v1288_v35  ;;  %v4880_v35 = vld [vmem:[#allocation11_spill] sm:$0xff] }
 0x211   : > { %v4440_v46 = vpop.eup %3367  ;;  %3387 = vpow2.f32 %v1252_v24 }
 0x212   : > { %v4446_v23 = vpop.eup %3369  ;;  %3389 = vpow2.f32 %v1284_v5 }
 0x213   : > { %1880 = vperm.xlu0 %3278, %v4385_v58   ;;  %v4448_v57 = vpop.eup %3371 }
 0x214   : > { %1805 = vperm.xlu1 %3277, %v4387_v51   ;;  %v4454_v14 = vpop.eup %3373 }
 0x215   : > { %v4456_v10 = vpop.eup %3375 }
 0x216   : > { %v4462_v9 = vpop.eup %3377 }
 0x217   : > { %1890 = vperm.xlu0 %3278, %v4398_v40   ;;  %v4464_v29 = vpop.eup %3379 }
 0x218   : > { %1855 = vperm.xlu1 %3277, %v4400_v42   ;;  %v4468_v52 = vpop.eup %3381 }
 0x219   : > { %v4470_v37 = vpop.eup %3383 }
 0x21a   : > { %v4474_v39 = vpop.eup %3385 }
 0x21b   : > { %1830 = vperm.xlu0 %3278, %v4408_v60   ;;  %v4477_v53 = vpop.eup %3387 }
 0x21c   : > { %1865 = vperm.xlu1 %3277, %v4410_v31   ;;  %v4482_v41 = vpop.eup %3389 }
 0x21f   : > { %1910 = vperm.xlu0 %3278, %v4418_v49  }
 0x220   : > { %1875 = vperm.xlu1 %3277, %v4420_v8  }
 0x223   : > { %1820 = vperm.xlu0 %3278, %v4428_v2  }
 0x224   : > { %1885 = vperm.xlu1 %3277, %v4430_v17  }
 0x227   : > { %1900 = vperm.xlu0 %3278, %v4438_v18  }
 0x228   : > { %1825 = vperm.xlu1 %3277, %v4440_v46  }
 0x22b   : > { %1850 = vperm.xlu0 %3278, %v4446_v23  }
 0x22c   : > { %1905 = vperm.xlu1 %3277, %v4448_v57  }
 0x22f   : > { %1930 = vperm.xlu0 %3278, %v4454_v14  }
 0x230   : > { %1815 = vperm.xlu1 %3277, %v4456_v10  }
 0x233   : > { %1840 = vperm.xlu0 %3278, %v4462_v9  }
 0x234   : > { %1895 = vperm.xlu1 %3277, %v4464_v29  }
 0x237   : > { %1920 = vperm.xlu0 %3278, %v4468_v52  }
 0x238   : > { %1845 = vperm.xlu1 %3277, %v4470_v37  }
 0x23a   : > { %v1305_v13 = vpop.permute.xlu1 %1304 }
 0x23b   : > { %v1454_v48 = vsub.f32 %v3727_v55, %v1305_v13 }
 0x23c   : > { %1925 = vperm.xlu1 %3277, %v4474_v39  }
 0x23d   : > { %v1488_v38 = vmul.f32 1.442695, %v1454_v48 }
 0x23e   : > { %v1385_v16 = vpop.permute.xlu1 %1384 }
 0x23f   : > { %v1295_v22 = vpop.permute.xlu0 %1294  ;;  %v1470_v45 = vsub.f32 %v4874_v34, %v1385_v16  ;;  %3391 = vpow2.f32 %v1488_v38  ;;  %v4881_v16 = vld [vmem:[#allocation13_spill] sm:$0xff] }
 0x240   : > { %1835 = vperm.xlu1 %3277, %v4477_v53   ;;  %v1452_v43 = vsub.f32 %v4877_v25, %v1295_v22 }
 0x241   : > { %v1520_v26 = vmul.f32 1.442695, %v1470_v45 }
 0x242   : > { %v1484_v4 = vmul.f32 1.442695, %v1452_v43 }
 0x243   : > { %v1375_v21 = vpop.permute.xlu1 %1374  ;;  %v1390_v30 = vpop.permute.xlu0 %1389  ;;  %3393 = vpow2.f32 %v1520_v26  ;;  %v4883_v26 = vld [vmem:[#allocation18_spill] sm:$0xff] }
 0x244   : > { %v1468_v1 = vsub.f32 %v4875_v11, %v1375_v21  ;;  %v1471_v28 = vsub.f32 %v4876_v61, %v1390_v30  ;;  %1915 = vperm.xlu1 %3277, %v4482_v41   ;;  %v4882_v30 = vld [vmem:[#allocation15_spill] sm:$0xff] }
 0x246   : > { %v1516_v6 = vmul.f32 1.442695, %v1468_v1  ;;  %v1522_v55 = vmul.f32 1.442695, %v1471_v28 }
 0x247   : > { %v1310_v47 = vpop.permute.xlu1 %1309  ;;  %v1380_v50 = vpop.permute.xlu0 %1379 }
 0x248   : > { %v1455_v20 = vsub.f32 %v4878_v33, %v1310_v47  ;;  %v1469_v27 = vsub.f32 %v4879_v15, %v1380_v50  ;;  %3395 = vpow2.f32 %v1516_v6  ;;  %v4884_v50 = vld [vmem:[#allocation14_spill] sm:$0xff] }
 0x249   : > { %3397 = vpow2.f32 %v1522_v55  ;;  %v3392_v13 = vpop.eup %3391 }
 0x24a   : > { %v1518_v12 = vmul.f32 1.442695, %v1469_v27  ;;  %v1490_v62 = vmul.f32 1.442695, %v1455_v20 }
 0x24b   : > { %v1300_v3 = vpop.permute.xlu1 %1299 }
 0x24c   : > { %v1453_v0 = vsub.f32 %v4880_v35, %v1300_v3  ;;  %3399 = vpow2.f32 %v1518_v12 }
 0x24d   : > { %3401 = vpow2.f32 %v1484_v4  ;;  %v3394_v34 = vpop.eup %3393  ;;  %v4885_v4 = vld [vmem:[#allocation17_spill] sm:$0xff] }
 0x24e   : > { %v1486_v24 = vmul.f32 1.442695, %v1453_v0  ;;  %3403 = vpow2.f32 %v1490_v62  ;;  %v1410_v5 = vpop.permute.xlu0 %1409  ;;  %v4886_v0 = vld [vmem:[#allocation19_spill] sm:$0xff] }
 0x24f   : > { %v1325_v63 = vpop.permute.xlu1 %1324  ;;  %v1475_v55 = vsub.f32 %v4884_v50, %v1410_v5 }
 0x250   : > { %3405 = vpow2.f32 %v1486_v24  ;;  %v1458_v22 = vsub.f32 %v4881_v16, %v1325_v63 }
 0x251   : > { %v1530_v16 = vmul.f32 1.442695, %v1475_v55 }
 0x252   : > { %v3396_v45 = vpop.eup %3395  ;;  %v1496_v28 = vmul.f32 1.442695, %v1458_v22 }
 0x253   : > { %v1405_v48 = vpop.permute.xlu1 %1404  ;;  %v4492_v21 = vpop.eup %3397 }
 0x254   : > { %v1474_v11 = vsub.f32 %v4882_v30, %v1405_v48  ;;  %v1974_v33 = vpack.c.bf16 %v4492_v21, %v3394_v34  ;;  %3407 = vpow2.f32 %v1496_v28  ;;  %v4887_v30 = vld [vmem:[#allocation12_spill] sm:$0xff] }
 0x256   : > { %1616 = vadd.xlane.f32.xlu0 %v3392_v13  ;;  %v1400_v1 = vpop.permute.xlu0 %1399  ;;  %v4495_v61 = vpop.eup %3399  ;;  %v1528_v15 = vmul.f32 1.442695, %v1474_v11 }
 0x257   : > { %v1315_v38 = vpop.permute.xlu1 %1314  ;;  %v1473_v25 = vsub.f32 %v4883_v26, %v1400_v1  ;;  %v3402_v43 = vpop.eup %3401  ;;  %v1973_v6 = vpack.c.bf16 %v4495_v61, %v3396_v45 }
 0x258   : > { %v3404_v47 = vpop.eup %3403  ;;  %v1456_v12 = vsub.f32 %v4885_v4, %v1315_v38  ;;  %3409 = vpow2.f32 %v1528_v15 }
 0x259   : > { %3218 = vmatprep.mubr.bf16.mxu1 %v1973_v6  ;;  %v1526_v62 = vmul.f32 1.442695, %v1473_v25  ;;  %v1966_v63 = vpack.c.bf16 %v3404_v47, %v3392_v13  ;;  %v4888_v13 = vld [vmem:[#allocation16_spill] sm:$0xff] }
 0x25a   : > { %v3406_v20 = vpop.eup %3405  ;;  %1648 = vadd.xlane.f32.xlu0 %v3394_v34  ;;  %v4501_v27 = vpop.permute.xlu0 %1775  ;;  %3219 = vmatmul.mubr.bf16.vlgmr.msra.gmra.mrb[16].mxu1 %v1974_v33  ;;  %v1492_v48 = vmul.f32 1.442695, %v1456_v12  ;;  %v4889_v33 = vld [vmem:[#allocation21_spill] sm:$0xff] }
 0x25b   : > { %v1395_v3 = vpop.permute.xlu1 %1394  ;;  %v1965_v35 = vpack.c.bf16 %v3406_v20, %v3402_v43  ;;  %3411 = vpow2.f32 %v1526_v62 }
 0x25c   : > { %v1472_v24 = vsub.f32 %v4886_v0, %v1395_v3 }
 0x25d   : > { %3186 = vmatprep.mubr.bf16.mxu0 %v1965_v35  ;;  %v4890_v35 = vld [vmem:[#allocation24_spill] sm:$0xff] }
 0x25e   : > { %v1524_v5 = vmul.f32 1.442695, %v1472_v24  ;;  %3187 = vmatmul.mubr.bf16.vlgmr.msra.gmra.mrb[16].mxu0 %v1966_v63  ;;  %1644 = vadd.xlane.f32.xlu0 %v3396_v45  ;;  %v1350_v22 = vpop.permute.xlu0 %1349  ;;  %v3408_v25 = vpop.eup %3407 }
 0x25f   : > { %v1330_v34 = vpop.permute.xlu1 %1329 }
 0x260   : > { %3413 = vpow2.f32 %v1524_v5  ;;  %v1459_v11 = vsub.f32 %v4887_v30, %v1330_v34  ;;  %v4892_v30 = vld [vmem:[#allocation20_spill] sm:$0xff] }
 0x261   : > { %3415 = vpow2.f32 %v1530_v16  ;;  %v4891_v16 = vld [vmem:[#allocation23_spill] sm:$0xff] }
 0x262   : > { %1614 = vadd.xlane.f32.xlu0 %v3406_v20  ;;  %v1430_v1 = vpop.permute.xlu0 %1429  ;;  %3417 = vpow2.f32 %v1492_v48  ;;  %v1498_v28 = vmul.f32 1.442695, %v1459_v11  ;;  %v3410_v55 = vpop.eup %3409 }
 0x263   : > { %v1320_v38 = vpop.permute.xlu1 %1319 }
 0x264   : > { %v1457_v26 = vsub.f32 %v4888_v13, %v1320_v38  ;;  %3419 = vpow2.f32 %v1498_v28  ;;  %v4893_v13 = vld [vmem:[#allocation26_spill] sm:$0xff] }
 0x265   : > { %v4508_v4 = vpop.eup %3411 }
 0x266   : > { %v1494_v6 = vmul.f32 1.442695, %v1457_v26  ;;  %1624 = vadd.xlane.f32.xlu0 %v3408_v25  ;;  %v1340_v50 = vpop.permute.xlu0 %1339 }
 0x267   : > { %v1345_v45 = vpop.permute.xlu1 %1344  ;;  %v1461_v0 = vsub.f32 %v4890_v35, %v1340_v50  ;;  %v4894_v50 = vld [vmem:[#allocation25_spill] sm:$0xff] }
 0x268   : > { %3421 = vpow2.f32 %v1494_v6  ;;  %v1462_v15 = vsub.f32 %v4889_v33, %v1345_v45  ;;  %1612 = vadd.xlane.f32.xlu1 %v3402_v43  ;;  %v1463_v43 = vsub.f32 %v4892_v30, %v1350_v22  ;;  %v4895_v33 = vld [vmem:[#allocation22_spill] sm:$0xff] }
 0x269   : > { %v1502_v38 = vmul.f32 1.442695, %v1461_v0  ;;  %v4896_v0 = vld [vmem:[#allocation27_spill] sm:$0xff] }
 0x26a   : > { %v3414_v20 = vpop.eup %3413  ;;  %v1504_v12 = vmul.f32 1.442695, %v1462_v15  ;;  %1656 = vadd.xlane.f32.xlu0 %v3410_v55  ;;  %v1420_v62 = vpop.permute.xlu0 %1419  ;;  %v1479_v15 = vsub.f32 %v4895_v33, %v1430_v1 }
 0x26b   : > { %v3416_v3 = vpop.eup %3415  ;;  %v1425_v24 = vpop.permute.xlu1 %1424  ;;  %v1975_v63 = vpack.c.bf16 %v4508_v4, %v3414_v20  ;;  %v1477_v26 = vsub.f32 %v4893_v13, %v1420_v62 }
 0x26c   : > { %3423 = vpow2.f32 %v1504_v12  ;;  %v1478_v5 = vsub.f32 %v4891_v16, %v1425_v24  ;;  %1618 = vadd.xlane.f32.xlu1 %v3404_v47  ;;  %v1976_v48 = vpack.c.bf16 %v3416_v3, %v3410_v55  ;;  %v3418_v34 = vpop.eup %3417  ;;  %v1506_v55 = vmul.f32 1.442695, %v1463_v43 }
 0x26d   : > { %3222 = vmatprep.mubr.bf16.mxu1 %v1975_v63  ;;  %v1534_v35 = vmul.f32 1.442695, %v1477_v26 }
 0x26e   : > { %v1536_v11 = vmul.f32 1.442695, %v1478_v5  ;;  %3223 = vmatmul.mubr.bf16.gmra.mrb[20].mxu1 %v1976_v48  ;;  %1620 = vadd.xlane.f32.xlu0 %v3418_v34  ;;  %v4514_v28 = vpop.permute.xlu0 %1369  ;;  %v3420_v47 = vpop.eup %3419 }
 0x26f   : > { %v1335_v6 = vpop.permute.xlu1 %1334  ;;  %v1968_v5 = vpack.c.bf16 %v3420_v47, %v3408_v25 }
 0x270   : > { %3425 = vpow2.f32 %v1536_v11  ;;  %v1460_v45 = vsub.f32 %v4894_v50, %v1335_v6  ;;  %1650 = vadd.xlane.f32.xlu1 %v4492_v21  ;;  %v1538_v21 = vmul.f32 1.442695, %v1479_v15  ;;  %v4897_v11 = vld [vmem:[#allocation29_spill] sm:$0xff]  ;;  %v4898_v6 = vld [vmem:[#allocation32_spill] sm:$0xff] }
 0x271   : > { %3427 = vpow2.f32 %v1502_v38 }
 0x272   : > { %v3422_v22 = vpop.eup %3421  ;;  %v1500_v12 = vmul.f32 1.442695, %v1460_v45  ;;  %1652 = vadd.xlane.f32.xlu0 %v3414_v20  ;;  %v1450_v16 = vpop.permute.xlu0 %1449 }
 0x273   : > { %v1415_v24 = vpop.permute.xlu1 %1414  ;;  %v1967_v63 = vpack.c.bf16 %v3422_v22, %v3418_v34 }
 0x274   : > { %3429 = vpow2.f32 %v1500_v12  ;;  %v1476_v62 = vsub.f32 %v4896_v0, %v1415_v24  ;;  %1646 = vadd.xlane.f32.xlu1 %v4495_v61  ;;  %v4900_v24 = vld [vmem:[#allocation28_spill] sm:$0xff] }
 0x275   : > { %3431 = vpow2.f32 %v1506_v55  ;;  %3190 = vmatprep.mubr.bf16.mxu0 %v1967_v63  ;;  %v1467_v63 = vsub.f32 %v4900_v24, %v4514_v28 }
 0x276   : > { %v3424_v48 = vpop.eup %3423  ;;  %v1532_v30 = vmul.f32 1.442695, %v1476_v62  ;;  %3191 = vmatmul.mubr.bf16.gmra.mrb[20].mxu0 %v1968_v5  ;;  %3433 = vpow2.f32 %v1534_v35  ;;  %v1360_v34 = vpop.permute.xlu0 %1359 }
 0x277   : > { %1632 = vadd.xlane.f32.xlu0 %v3424_v48  ;;  %v4522_v1 = vpop.permute.xlu1 %1780  ;;  %v1465_v50 = vsub.f32 %v4898_v6, %v1360_v34 }
 0x278   : > { %3435 = vpow2.f32 %v1532_v30  ;;  %1626 = vadd.xlane.f32.xlu1 %v3420_v47  ;;  %v4899_v47 = vld [vmem:[#allocation31_spill] sm:$0xff] }
 0x279   : > { %3437 = vpow2.f32 %v1538_v21  ;;  %v1510_v5 = vmul.f32 1.442695, %v1465_v50  ;;  %v4901_v21 = vld [vmem:[#allocation34_spill] sm:$0xff] }
 0x27a   : > { %v3426_v20 = vpop.eup %3425  ;;  %v1440_v33 = vpop.permute.xlu0 %1439 }
 0x27b   : > { %1664 = vadd.xlane.f32.xlu0 %v3426_v20  ;;  %v1365_v43 = vpop.permute.xlu1 %1364  ;;  %v3428_v25 = vpop.eup %3427  ;;  %v1481_v30 = vsub.f32 %v4901_v21, %v1440_v33 }
 0x27c   : > { %v1466_v61 = vsub.f32 %v4897_v11, %v1365_v43  ;;  %1658 = vadd.xlane.f32.xlu1 %v3416_v3  ;;  %v4902_v11 = vld [vmem:[#allocation33_spill] sm:$0xff] }
 0x27d   : > { %v1542_v6 = vmul.f32 1.442695, %v1481_v30 }
 0x27e   : > { %v3430_v38 = vpop.eup %3429  ;;  %v1512_v13 = vmul.f32 1.442695, %v1466_v61 }
 0x27f   : > { %v3432_v26 = vpop.eup %3431  ;;  %1628 = vadd.xlane.f32.xlu0 %v3430_v38  ;;  %v1445_v45 = vpop.permute.xlu1 %1444  ;;  %v1969_v55 = vpack.c.bf16 %v3428_v25, %v3430_v38  ;;  %v4903_v38 = vld [vmem:[#allocation30_spill] sm:$0xff] }
 0x280   : > { %3439 = vpow2.f32 %v1512_v13  ;;  %v1482_v15 = vsub.f32 %v4899_v47, %v1445_v45  ;;  %1622 = vadd.xlane.f32.xlu1 %v3422_v22  ;;  %v1970_v12 = vpack.c.bf16 %v3432_v26, %v3424_v48  ;;  %v3434_v35 = vpop.eup %3433  ;;  %v1514_v48 = vmul.f32 1.442695, %v1467_v63  ;;  %v4904_v45 = vld [vmem:[#allocation35_spill] sm:$0xff] }
 0x281   : > { %3194 = vmatprep.mubr.bf16.mxu0 %v1969_v55  ;;  %v1483_v28 = vsub.f32 %v4903_v38, %v1450_v16 }
 0x282   : > { %v3436_v3 = vpop.eup %3435  ;;  %v1544_v0 = vmul.f32 1.442695, %v1482_v15  ;;  %3195 = vmatmul.mubr.bf16.gmra.mrb[24].mxu0 %v1970_v12 }
 0x283   : > { %v3438_v62 = vpop.eup %3437  ;;  %1660 = vadd.xlane.f32.xlu0 %v3436_v3  ;;  %v1355_v34 = vpop.permute.xlu1 %1354  ;;  %v1977_v43 = vpack.c.bf16 %v3434_v35, %v3436_v3  ;;  %v1546_v33 = vmul.f32 1.442695, %v1483_v28 }
 0x284   : > { %3441 = vpow2.f32 %v1544_v0  ;;  %v1464_v61 = vsub.f32 %v4902_v11, %v1355_v34  ;;  %1654 = vadd.xlane.f32.xlu1 %v4508_v4  ;;  %v1978_v22 = vpack.c.bf16 %v3438_v62, %v3426_v20  ;;  %v4534_v4 = vpop.permute.xlu0 %1790 }
 0x285   : > { %3226 = vmatprep.mubr.bf16.mxu1 %v1977_v43  ;;  %3443 = vpow2.f32 %v1510_v5 }
 0x286   : > { %v1508_v13 = vmul.f32 1.442695, %v1464_v61  ;;  %3227 = vmatmul.mubr.bf16.gmra.mrb[24].mxu1 %v1978_v22 }
 0x287   : > { %v1435_v50 = vpop.permute.xlu1 %1434 }
 0x288   : > { %3445 = vpow2.f32 %v1508_v13  ;;  %v1480_v55 = vsub.f32 %v4904_v45, %v1435_v50  ;;  %1634 = vadd.xlane.f32.xlu1 %v3432_v26  ;;  %v4536_v12 = vpop.permute.xlu0 %1800 }
 0x289   : > { %3447 = vpow2.f32 %v1514_v48 }
 0x28a   : > { %v3440_v47 = vpop.eup %3439  ;;  %v1540_v15 = vmul.f32 1.442695, %v1480_v55  ;;  %3449 = vpow2.f32 %v1542_v6 }
 0x28b   : > { %1640 = vadd.xlane.f32.xlu0 %v3440_v47  ;;  %v4540_v34 = vpop.permute.xlu1 %1785 }
 0x28c   : > { %3451 = vpow2.f32 %v1540_v15  ;;  %1666 = vadd.xlane.f32.xlu1 %v3438_v62  ;;  %v4538_v30 = vpop.permute.xlu0 %1810 }
 0x28d   : > { %3453 = vpow2.f32 %v1546_v33 }
 0x28e   : > { %v3442_v16 = vpop.eup %3441 }
 0x28f   : > { %1672 = vadd.xlane.f32.xlu0 %v3442_v16  ;;  %v3444_v20 = vpop.eup %3443 }
 0x290   : > { %1630 = vadd.xlane.f32.xlu1 %v3428_v25  ;;  %v4542_v43 = vpop.permute.xlu0 %1860 }
 0x292   : > { %v3446_v24 = vpop.eup %3445 }
 0x293   : > { %v3448_v63 = vpop.eup %3447  ;;  %1636 = vadd.xlane.f32.xlu0 %v3446_v24  ;;  %v1971_v26 = vpack.c.bf16 %v3444_v20, %v3446_v24 }
 0x294   : > { %1662 = vadd.xlane.f32.xlu1 %v3434_v35  ;;  %v1972_v3 = vpack.c.bf16 %v3448_v63, %v3440_v47  ;;  %v3450_v0 = vpop.eup %3449  ;;  %v4544_v35 = vpop.permute.xlu1 %1795 }
 0x295   : > { %3198 = vmatprep.mubr.bf16.mxu0 %v1971_v26  ;;  %v4546_v11 = vpop.permute.xlu0 %1870 }
 0x296   : > { %v3452_v5 = vpop.eup %3451  ;;  %3199 = vmatmul.mubr.bf16.gmra.mrb[28].mxu0 %v1972_v3 }
 0x297   : > { %v3454_v21 = vpop.eup %3453  ;;  %1668 = vadd.xlane.f32.xlu0 %v3452_v5  ;;  %v1979_v62 = vpack.c.bf16 %v3450_v0, %v3452_v5  ;;  %v1550_v5 = vld [vmem:[#allocation3 + $0x10] sm:$0xff] }
 0x298   : > { %1642 = vadd.xlane.f32.xlu1 %v3448_v63  ;;  %v1980_v25 = vpack.c.bf16 %v3454_v21, %v3442_v16  ;;  %v4548_v61 = vpop.permute.xlu1 %1805 }
 0x299   : > { %3230 = vmatprep.mubr.bf16.mxu1 %v1979_v62  ;;  %v4550_v22 = vpop.permute.xlu0 %1880 }
 0x29a   : > { %3231 = vmatmul.mubr.bf16.gmra.mrb[28].mxu1 %v1980_v25  ;;  %v1566_v25 = vld [vmem:[#allocation3 + $0x90] sm:$0xff] }
 0x29c   : > { %1674 = vadd.xlane.f32.xlu1 %v3454_v21  ;;  %v4552_v48 = vpop.permute.xlu1 %1855  ;;  %v1582_v21 = vmul.f32 %v4366_v54, %v1550_v5  ;;  %v1549_v54 = vld [vmem:[#allocation3 + $0x8] sm:$0xff] }
 0x29d   : > { %v4554_v38 = vpop.permute.xlu0 %1890 }
 0x2a0   : > { %1638 = vadd.xlane.f32.xlu1 %v3444_v20  ;;  %v4556_v28 = vpop.permute.xlu1 %1865 }
 0x2a1   : > { %v4558_v13 = vpop.permute.xlu0 %1830 }
 0x2a4   : > { %1670 = vadd.xlane.f32.xlu1 %v3450_v0  ;;  %v4560_v6 = vpop.permute.xlu1 %1875 }
 0x2a5   : > { %v4562_v50 = vpop.permute.xlu0 %1910 }
 0x2a6   : > { %4905 = vst [vmem:[#allocation5_spill] sm:$0xff] %v4562_v50 }
 0x2a8   : > { %v4564_v45 = vpop.permute.xlu1 %1885 }
 0x2a9   : > { %v4566_v55 = vpop.permute.xlu0 %1820 }
 0x2aa   : > { %4906 = vst [vmem:[#allocation9_spill] sm:$0xff] %v4566_v55 }
 0x2ac   : > { %v4568_v33 = vpop.permute.xlu1 %1825 }
 0x2ad   : > { %v4570_v47 = vpop.permute.xlu0 %1900 }
 0x2ae   : > { %4907 = vst [vmem:[#allocation8_spill] sm:$0xff] %v4570_v47 }
 0x2b0   : > { %v4572_v15 = vpop.permute.xlu1 %1905 }
 0x2b1   : > { %4908 = vst [vmem:[#allocation7_spill] sm:$0xff] %v4572_v15  ;;  %v4574_v16 = vpop.permute.xlu0 %1850 }
 0x2b2   : > { %4909 = vst [vmem:[#allocation6_spill] sm:$0xff] %v4574_v16 }
 0x2b4   : > { %v4576_v20 = vpop.permute.xlu1 %1815 }
 0x2b5   : > { %v4578_v24 = vpop.permute.xlu0 %1930 }
 0x2b6   : > { %4910 = vst [vmem:[#allocation10_spill] sm:$0xff] %v4578_v24  ;;  %v1598_v24 = vmul.f32 %v4410_v31, %v1566_v25  ;;  %v1554_v31 = vld [vmem:[#allocation3 + $0x30] sm:$0xff] }
 0x2b8   : > { %v4580_v63 = vpop.permute.xlu1 %1895 }
 0x2b9   : > { %4911 = vst [vmem:[#allocation11_spill] sm:$0xff] %v4580_v63  ;;  %v4582_v26 = vpop.permute.xlu0 %1840  ;;  %v1564_v63 = vld [vmem:[#allocation3 + $0x80] sm:$0xff] }
 0x2ba   : > { %4912 = vst [vmem:[#allocation13_spill] sm:$0xff] %v4582_v26  ;;  %v1596_v26 = vmul.f32 %v4400_v42, %v1564_v63  ;;  %v1586_v42 = vmul.f32 %v4387_v51, %v1554_v31  ;;  %v1570_v63 = vld [vmem:[#allocation3 + $0xb0] sm:$0xff]  ;;  %v1567_v31 = vld [vmem:[#allocation3 + $0x98] sm:$0xff] }
 0x2bc   : > { %v4584_v3 = vpop.permute.xlu1 %1845 }
 0x2bd   : > { %4913 = vst [vmem:[#allocation15_spill] sm:$0xff] %v4584_v3  ;;  %v4586_v0 = vpop.permute.xlu0 %1920 }
 0x2be   : > { %4914 = vst [vmem:[#allocation18_spill] sm:$0xff] %v4586_v0 }
 0x2c0   : > { %v4589_v50 = vpop.permute.xlu1 %1925 }
 0x2c1   : > { %4915 = vst [vmem:[#allocation14_spill] sm:$0xff] %v4589_v50  ;;  %v1551_v50 = vld [vmem:[#allocation3 + $0x18] sm:$0xff] }
 0x2c4   : > { %v4595_v0 = vpop.permute.xlu1 %1835 }
 0x2c8   : > { %v4599_v25 = vpop.permute.xlu1 %1915 }
 0x2e3   : > { %v1617_v62 = vpop.xlane.xlu0 %1616 }
 0x2e4   : > { %v1678_v47 = vadd.f32 %v1617_v62, %v1582_v21 }
 0x2e6   : > { %1711 = vst.msk [vmem:[#allocation3 + $0x10] sm:$0xff] %vm391_vm1, %v1678_v47  ;;  %v1581_v47 = vmul.f32 %v4322_v59, %v1549_v54  ;;  %v1602_v54 = vmul.f32 %v4430_v17, %v1570_v63  ;;  %v1599_v17 = vmul.f32 %v4377_v32, %v1567_v31 }
 0x2e7   : > { %v1649_v16 = vpop.xlane.xlu0 %1648 }
 0x2e8   : > { %v1694_v15 = vadd.f32 %v1649_v16, %v1598_v24 }
 0x2ea   : > { %1727 = vst.msk [vmem:[#allocation3 + $0x90] sm:$0xff] %vm391_vm1, %v1694_v15  ;;  %v1548_v15 = vld [vmem:[#allocation3] sm:$0xff] }
 0x2eb   : > { %v1645_v3 = vpop.xlane.xlu0 %1644 }
 0x2ec   : > { %v1692_v5 = vadd.f32 %v1645_v3, %v1596_v26  ;;  %v4916_v3 = vld [vmem:[#allocation36_spill] sm:$0xff] }
 0x2ed   : > { %v2436_v55 = vld [vmem:[#allocation3 + $0x10] sm:$0xff] }
 0x2ee   : > { %1725 = vst.msk [vmem:[#allocation3 + $0x80] sm:$0xff] %vm391_vm1, %v1692_v5  ;;  %2478 = vperm.xlu1 %3277, %v2436_v55   ;;  %v1580_v5 = vmul.f32 %v4916_v3, %v1548_v15  ;;  %v1568_v3 = vld [vmem:[#allocation3 + $0xa0] sm:$0xff] }
 0x2ef   : > { %v1615_v21 = vpop.xlane.xlu0 %1614 }
 0x2f0   : > { %v1677_v62 = vadd.f32 %v1615_v21, %v1581_v47  ;;  %v1552_v21 = vld [vmem:[#allocation3 + $0x20] sm:$0xff] }
 0x2f1   : > { %v2452_v16 = vld [vmem:[#allocation3 + $0x90] sm:$0xff]  ;;  %v1584_v15 = vmul.f32 %v4379_v7, %v1552_v21 }
 0x2f2   : > { %1710 = vst.msk [vmem:[#allocation3 + $0x8] sm:$0xff] %vm391_vm1, %v1677_v62  ;;  %2558 = vperm.xlu1 %3277, %v2452_v16   ;;  %v1583_v16 = vmul.f32 %v4341_v36, %v1551_v50  ;;  %v1600_v36 = vmul.f32 %v4420_v8, %v1568_v3  ;;  %v1571_v3 = vld [vmem:[#allocation3 + $0xb8] sm:$0xff] }
 0x2f3   : > { %v1625_v24 = vpop.xlane.xlu0 %1624 }
 0x2f4   : > { %v1682_v26 = vadd.f32 %v1625_v24, %v1586_v42 }
 0x2f5   : > { %v1613_v55 = vpop.xlane.xlu1 %1612 }
 0x2f6   : > { %1715 = vst.msk [vmem:[#allocation3 + $0x30] sm:$0xff] %vm391_vm1, %v1682_v26  ;;  %v1676_v59 = vadd.f32 %v1613_v55, %v1580_v5  ;;  %v1565_v5 = vld [vmem:[#allocation3 + $0x88] sm:$0xff] }
 0x2f7   : > { %v1657_v47 = vpop.xlane.xlu0 %1656 }
 0x2f8   : > { %1709 = vst.msk [vmem:[#allocation3] sm:$0xff] %vm391_vm1, %v1676_v59  ;;  %v1698_v62 = vadd.f32 %v1657_v47, %v1602_v54  ;;  %v1597_v54 = vmul.f32 %v4364_v44, %v1565_v5  ;;  %v1558_v47 = vld [vmem:[#allocation3 + $0x50] sm:$0xff] }
 0x2f9   : > { %v1619_v51 = vpop.xlane.xlu1 %1618  ;;  %v1590_v31 = vmul.f32 %v4440_v46, %v1558_v47 }
 0x2fa   : > { %1731 = vst.msk [vmem:[#allocation3 + $0xb0] sm:$0xff] %vm391_vm1, %v1698_v62  ;;  %v1679_v42 = vadd.f32 %v1619_v51, %v1583_v16  ;;  %v1555_v62 = vld [vmem:[#allocation3 + $0x38] sm:$0xff]  ;;  %v2450_v51 = vld [vmem:[#allocation3 + $0x80] sm:$0xff] }
 0x2fb   : > { %v1621_v24 = vpop.xlane.xlu0 %1620 }
 0x2fc   : > { %1712 = vst.msk [vmem:[#allocation3 + $0x18] sm:$0xff] %vm391_vm1, %v1679_v42  ;;  %v1680_v26 = vadd.f32 %v1621_v24, %v1584_v15  ;;  %v1587_v42 = vmul.f32 %v4355_v19, %v1555_v62  ;;  %v1574_v15 = vld [vmem:[#allocation3 + $0xd0] sm:$0xff] }
 0x2fd   : > { %v1651_v63 = vpop.xlane.xlu1 %1650  ;;  %v1606_v5 = vmul.f32 %v4448_v57, %v1574_v15 }
 0x2fe   : > { %1713 = vst.msk [vmem:[#allocation3 + $0x20] sm:$0xff] %vm391_vm1, %v1680_v26  ;;  %v1695_v55 = vadd.f32 %v1651_v63, %v1599_v17  ;;  %v2440_v63 = vld [vmem:[#allocation3 + $0x30] sm:$0xff] }
 0x2ff   : > { %v2434_v50 = vld [vmem:[#allocation3] sm:$0xff]  ;;  %v1653_v59 = vpop.xlane.xlu0 %1652 }
 0x300   : > { %1728 = vst.msk [vmem:[#allocation3 + $0x98] sm:$0xff] %vm391_vm1, %v1695_v55  ;;  %2468 = vperm.xlu1 %3277, %v2434_v50   ;;  %v1696_v7 = vadd.f32 %v1653_v59, %v1600_v36  ;;  %v1603_v55 = vmul.f32 %v4398_v40, %v1571_v3  ;;  %v1556_v36 = vld [vmem:[#allocation3 + $0x40] sm:$0xff]  ;;  %v1553_v59 = vld [vmem:[#allocation3 + $0x28] sm:$0xff]  ;;  %v1559_v3 = vld [vmem:[#allocation3 + $0x58] sm:$0xff] }
 0x301   : > { %v1647_v21 = vpop.xlane.xlu1 %1646  ;;  %v2456_v47 = vld [vmem:[#allocation3 + $0xb0] sm:$0xff]  ;;  %v1585_v62 = vmul.f32 %v4349_v56, %v1553_v59 }
 0x302   : > { %1729 = vst.msk [vmem:[#allocation3 + $0xa0] sm:$0xff] %vm391_vm1, %v1696_v7  ;;  %v1693_v32 = vadd.f32 %v1647_v21, %v1597_v54  ;;  %v2435_v54 = vld [vmem:[#allocation3 + $0x8] sm:$0xff]  ;;  %v1588_v21 = vmul.f32 %v4456_v10, %v1556_v36 }
 0x303   : > { %v2437_v16 = vld [vmem:[#allocation3 + $0x18] sm:$0xff] }
 0x304   : > { %1726 = vst.msk [vmem:[#allocation3 + $0x88] sm:$0xff] %vm391_vm1, %v1693_v32  ;;  %2483 = vperm.xlu0 %3278, %v2437_v16   ;;  %2548 = vperm.xlu1 %3277, %v2450_v51   ;;  %v1633_v8 = vpop.xlane.xlu0 %1632  ;;  %v1572_v32 = vld [vmem:[#allocation3 + $0xc0] sm:$0xff]  ;;  %v1569_v51 = vld [vmem:[#allocation3 + $0xa8] sm:$0xff] }
 0x305   : > { %v1686_v24 = vadd.f32 %v1633_v8, %v1590_v31  ;;  %v1627_v44 = vpop.xlane.xlu1 %1626  ;;  %v1604_v15 = vmul.f32 %v4464_v29, %v1572_v32  ;;  %v1591_v29 = vmul.f32 %v4408_v60, %v1559_v3 }
 0x306   : > { %v1683_v26 = vadd.f32 %v1627_v44, %v1587_v42  ;;  %v2438_v42 = vld [vmem:[#allocation3 + $0x20] sm:$0xff] }
 0x307   : > { %1719 = vst.msk [vmem:[#allocation3 + $0x50] sm:$0xff] %vm391_vm1, %v1686_v24  ;;  %v2453_v17 = vld [vmem:[#allocation3 + $0x98] sm:$0xff]  ;;  %v1601_v24 = vmul.f32 %v4385_v58, %v1569_v51  ;;  %v1560_v51 = vld [vmem:[#allocation3 + $0x60] sm:$0xff] }
 0x308   : > { %1716 = vst.msk [vmem:[#allocation3 + $0x38] sm:$0xff] %vm391_vm1, %v1683_v26  ;;  %2563 = vperm.xlu0 %3278, %v2453_v17   ;;  %2498 = vperm.xlu1 %3277, %v2440_v63   ;;  %v1665_v46 = vpop.xlane.xlu0 %1664 }
 0x309   : > { %v1702_v19 = vadd.f32 %v1665_v46, %v1606_v5  ;;  %v1659_v50 = vpop.xlane.xlu1 %1658  ;;  %v2454_v63 = vld [vmem:[#allocation3 + $0xa0] sm:$0xff]  ;;  %v1562_v5 = vld [vmem:[#allocation3 + $0x70] sm:$0xff] }
 0x30a   : > { %v1699_v7 = vadd.f32 %v1659_v50, %v1603_v55  ;;  %v1575_v55 = vld [vmem:[#allocation3 + $0xd8] sm:$0xff]  ;;  %v1594_v50 = vmul.f32 %v4470_v37, %v1562_v5 }
 0x30b   : > { %1735 = vst.msk [vmem:[#allocation3 + $0xd0] sm:$0xff] %vm391_vm1, %v1702_v19  ;;  %v2451_v8 = vld [vmem:[#allocation3 + $0x88] sm:$0xff] }
 0x30c   : > { %1732 = vst.msk [vmem:[#allocation3 + $0xb8] sm:$0xff] %vm391_vm1, %v1699_v7  ;;  %2473 = vperm.xlu0 %3278, %v2435_v54   ;;  %2578 = vperm.xlu1 %3277, %v2456_v47   ;;  %v1629_v57 = vpop.xlane.xlu0 %1628  ;;  %v1607_v7 = vmul.f32 %v4418_v49, %v1575_v55  ;;  %v1578_v54 = vld [vmem:[#allocation3 + $0xf0] sm:$0xff] }
 0x30d   : > { %v1684_v40 = vadd.f32 %v1629_v57, %v1588_v21  ;;  %v1623_v16 = vpop.xlane.xlu1 %1622  ;;  %v1557_v57 = vld [vmem:[#allocation3 + $0x48] sm:$0xff] }
 0x30e   : > { %v1681_v31 = vadd.f32 %v1623_v16, %v1585_v62  ;;  %v2444_v58 = vld [vmem:[#allocation3 + $0x50] sm:$0xff]  ;;  %v1589_v16 = vmul.f32 %v4428_v2, %v1557_v57 }
 0x30f   : > { %1717 = vst.msk [vmem:[#allocation3 + $0x40] sm:$0xff] %vm391_vm1, %v1684_v40  ;;  %v2441_v17 = vld [vmem:[#allocation3 + $0x38] sm:$0xff]  ;;  %v1610_v40 = vmul.f32 %v4474_v39, %v1578_v54  ;;  %v1759_v54 = vld [vmem:[#allocation4 + $0x90] sm:$0xff] }
 0x310   : > { %1714 = vst.msk [vmem:[#allocation3 + $0x28] sm:$0xff] %vm391_vm1, %v1681_v31  ;;  %2553 = vperm.xlu0 %3278, %v2451_v8   ;;  %2488 = vperm.xlu1 %3277, %v2438_v42   ;;  %v1661_v10 = vpop.xlane.xlu0 %1660  ;;  %v1573_v8 = vld [vmem:[#allocation3 + $0xc8] sm:$0xff] }
 0x311   : > { %v1700_v44 = vadd.f32 %v1661_v10, %v1604_v15  ;;  %v1655_v56 = vpop.xlane.xlu1 %1654 }
 0x312   : > { %v1697_v26 = vadd.f32 %v1655_v56, %v1601_v24  ;;  %v2460_v32 = vld [vmem:[#allocation3 + $0xd0] sm:$0xff]  ;;  %v1592_v24 = vmul.f32 %v4477_v53, %v1560_v51  ;;  %v1576_v56 = vld [vmem:[#allocation3 + $0xe0] sm:$0xff] }
 0x313   : > { %1733 = vst.msk [vmem:[#allocation3 + $0xc0] sm:$0xff] %vm391_vm1, %v1700_v44  ;;  %v2457_v19 = vld [vmem:[#allocation3 + $0xb8] sm:$0xff]  ;;  %v1605_v44 = vmul.f32 %v4438_v18, %v1573_v8  ;;  %v1608_v5 = vmul.f32 %v4482_v41, %v1576_v56  ;;  %v1742_v56 = vld [vmem:[#allocation4 + $0x8] sm:$0xff] }
 0x314   : > { %1730 = vst.msk [vmem:[#allocation3 + $0xa8] sm:$0xff] %vm391_vm1, %v1697_v26  ;;  %2503 = vperm.xlu0 %3278, %v2441_v17   ;;  %2568 = vperm.xlu1 %3277, %v2454_v63   ;;  %v1563_v26 = vld [vmem:[#allocation3 + $0x78] sm:$0xff] }
 0x315   : > { %v1635_v46 = vpop.xlane.xlu1 %1634 }
 0x316   : > { %v1687_v36 = vadd.f32 %v1635_v46, %v1591_v29  ;;  %v2442_v10 = vld [vmem:[#allocation3 + $0x40] sm:$0xff]  ;;  %v1595_v46 = vmul.f32 %v4446_v23, %v1563_v26 }
 0x317   : > { %v2439_v62 = vld [vmem:[#allocation3 + $0x28] sm:$0xff]  ;;  %v1757_v23 = vld [vmem:[#allocation4 + $0x80] sm:$0xff] }
 0x318   : > { %1720 = vst.msk [vmem:[#allocation3 + $0x58] sm:$0xff] %vm391_vm1, %v1687_v36  ;;  %2583 = vperm.xlu0 %3278, %v2457_v19   ;;  %2518 = vperm.xlu1 %3277, %v2444_v58   ;;  %v1641_v59 = vpop.xlane.xlu0 %1640  ;;  %v1579_v36 = vld [vmem:[#allocation3 + $0xf8] sm:$0xff]  ;;  %v1949_v51 = vmul.f32 %v4552_v48, %v1757_v23 }
 0x319   : > { %v1690_v47 = vadd.f32 %v1641_v59, %v1594_v50  ;;  %v1667_v21 = vpop.xlane.xlu1 %1666  ;;  %v1611_v41 = vmul.f32 %v4454_v14, %v1579_v36  ;;  %v1741_v14 = vld [vmem:[#allocation4] sm:$0xff] }
 0x31a   : > { %v1703_v60 = vadd.f32 %v1667_v21, %v1607_v7  ;;  %v2458_v29 = vld [vmem:[#allocation3 + $0xc0] sm:$0xff]  ;;  %v1561_v7 = vld [vmem:[#allocation3 + $0x68] sm:$0xff]  ;;  %v1933_v48 = vmul.f32 %v4501_v27, %v1741_v14 }
 0x31b   : > { %1723 = vst.msk [vmem:[#allocation3 + $0x70] sm:$0xff] %vm391_vm1, %v1690_v47  ;;  %v2455_v15 = vld [vmem:[#allocation3 + $0xa8] sm:$0xff] }
 0x31c   : > { %1736 = vst.msk [vmem:[#allocation3 + $0xd8] sm:$0xff] %vm391_vm1, %v1703_v60  ;;  %2493 = vperm.xlu0 %3278, %v2439_v62   ;;  %2598 = vperm.xlu1 %3277, %v2460_v32   ;;  %v1673_v37 = vpop.xlane.xlu0 %1672  ;;  %v1760_v60 = vld [vmem:[#allocation4 + $0x98] sm:$0xff]  ;;  %v1593_v62 = vmul.f32 %v4462_v9, %v1561_v7  ;;  %v1743_v32 = vld [vmem:[#allocation4 + $0x10] sm:$0xff] }
 0x31d   : > { %v1706_v49 = vadd.f32 %v1673_v37, %v1610_v40  ;;  %v1631_v31 = vpop.xlane.xlu1 %1630  ;;  %v1758_v40 = vld [vmem:[#allocation4 + $0x88] sm:$0xff]  ;;  %v1951_v37 = vmul.f32 %v4556_v28, %v1759_v54  ;;  %v1935_v9 = vmul.f32 %v4540_v34, %v1743_v32  ;;  %v1764_v7 = vld [vmem:[#allocation4 + $0xb8] sm:$0xff] }
 0x31e   : > { %v1685_v42 = vadd.f32 %v1631_v31, %v1589_v16  ;;  %v1762_v54 = vld [vmem:[#allocation4 + $0xa8] sm:$0xff] }
 0x31f   : > { %1739 = vst.msk [vmem:[#allocation3 + $0xf0] sm:$0xff] %vm391_vm1, %v1706_v49  ;;  %v2445_v63 = vld [vmem:[#allocation3 + $0x58] sm:$0xff] }
 0x320   : > { %1718 = vst.msk [vmem:[#allocation3 + $0x48] sm:$0xff] %vm391_vm1, %v1685_v42  ;;  %2573 = vperm.xlu0 %3278, %v2455_v15   ;;  %2508 = vperm.xlu1 %3277, %v2442_v10   ;;  %v1637_v39 = vpop.xlane.xlu0 %1636  ;;  %v1577_v42 = vld [vmem:[#allocation3 + $0xe8] sm:$0xff]  ;;  %v1744_v15 = vld [vmem:[#allocation4 + $0x18] sm:$0xff]  ;;  %v1952_v10 = vmul.f32 %v4546_v11, %v1760_v60  ;;  %v1956_v60 = vmul.f32 %v4554_v38, %v1764_v7 }
 0x321   : > { %v1688_v2 = vadd.f32 %v1637_v39, %v1592_v24  ;;  %v1663_v3 = vpop.xlane.xlu1 %1662  ;;  %v1746_v38 = vld [vmem:[#allocation4 + $0x28] sm:$0xff] }
 0x322   : > { %v1701_v17 = vadd.f32 %v1663_v3, %v1605_v44  ;;  %v2448_v50 = vld [vmem:[#allocation3 + $0x70] sm:$0xff] }
 0x323   : > { %1721 = vst.msk [vmem:[#allocation3 + $0x60] sm:$0xff] %vm391_vm1, %v1688_v2  ;;  %v2461_v58 = vld [vmem:[#allocation3 + $0xd8] sm:$0xff]  ;;  %v1950_v2 = vmul.f32 %v4542_v43, %v1758_v40  ;;  %v1954_v40 = vmul.f32 %v4550_v22, %v1762_v54 }
 0x324   : > { %1734 = vst.msk [vmem:[#allocation3 + $0xc8] sm:$0xff] %vm391_vm1, %v1701_v17  ;;  %2523 = vperm.xlu0 %3278, %v2445_v63   ;;  %2588 = vperm.xlu1 %3277, %v2458_v29   ;;  %v1669_v53 = vpop.xlane.xlu0 %1668  ;;  %v1609_v63 = vmul.f32 %v4468_v52, %v1577_v42  ;;  %v1936_v29 = vmul.f32 %v4534_v4, %v1744_v15 }
 0x325   : > { %v1704_v55 = vadd.f32 %v1669_v53, %v1608_v5  ;;  %v1643_v18 = vpop.xlane.xlu1 %1642 }
 0x326   : > { %v1691_v19 = vadd.f32 %v1643_v18, %v1595_v46  ;;  %v1934_v46 = vmul.f32 %v4522_v1, %v1742_v56 }
 0x327   : > { %1737 = vst.msk [vmem:[#allocation3 + $0xe0] sm:$0xff] %vm391_vm1, %v1704_v55  ;;  %v2443_v57 = vld [vmem:[#allocation3 + $0x48] sm:$0xff] }
 0x328   : > { %1724 = vst.msk [vmem:[#allocation3 + $0x78] sm:$0xff] %vm391_vm1, %v1691_v19  ;;  %2603 = vperm.xlu0 %3278, %v2461_v58   ;;  %2538 = vperm.xlu1 %3277, %v2448_v50   ;;  %v2464_v19 = vld [vmem:[#allocation3 + $0xf0] sm:$0xff] }
 0x329   : > { %v1675_v59 = vpop.xlane.xlu1 %1674 }
 0x32a   : > { %v1707_v47 = vadd.f32 %v1675_v59, %v1611_v41  ;;  %v2446_v21 = vld [vmem:[#allocation3 + $0x60] sm:$0xff]  ;;  %v1763_v41 = vld [vmem:[#allocation4 + $0xb0] sm:$0xff] }
 0x32b   : > { %v2459_v44 = vld [vmem:[#allocation3 + $0xc8] sm:$0xff]  ;;  %v1761_v59 = vld [vmem:[#allocation4 + $0xa0] sm:$0xff] }
 0x32c   : > { %1740 = vst.msk [vmem:[#allocation3 + $0xf8] sm:$0xff] %vm391_vm1, %v1707_v47  ;;  %2513 = vperm.xlu0 %3278, %v2443_v57   ;;  %2528 = vperm.xlu1 %3277, %v2446_v21   ;;  %v1955_v47 = vmul.f32 %v4564_v45, %v1763_v41  ;;  %v1953_v23 = vmul.f32 %v4560_v6, %v1761_v59  ;;  %v1748_v6 = vld [vmem:[#allocation4 + $0x38] sm:$0xff] }
 0x32d   : > { %v1639_v16 = vpop.xlane.xlu1 %1638  ;;  %v3220_v49 = vpop.f32.mrb[16].mxu1  ;;  %v1940_v15 = vmul.f32 %v4538_v30, %v1748_v6  ;;  %v1752_v30 = vld [vmem:[#allocation4 + $0x58] sm:$0xff]  ;;  %v1769_v6 = vld [vmem:[#allocation4 + $0xe0] sm:$0xff] }
 0x32e   : > { %v1689_v31 = vadd.f32 %v1639_v16, %v1593_v62  ;;  %v2462_v8 = vld [vmem:[#allocation3 + $0xe0] sm:$0xff]  ;;  %v2321_v24 = vadd.f32 %v3220_v49, %v1951_v37  ;;  %v2240_v39 = vpop.f32.mrb[17].mxu1  ;;  %v1747_v49 = vld [vmem:[#allocation4 + $0x30] sm:$0xff]  ;;  %v4921_v59 = vld [vmem:[#allocation8_spill] sm:$0xff] }
 0x32f   : > { %v2319_v28 = vadd.f32 %v2240_v39, %v1949_v51  ;;  %v3221_v3 = vpop.f32.mrb[18].mxu1  ;;  %v2449_v36 = vld [vmem:[#allocation3 + $0x78] sm:$0xff]  ;;  %v1938_v39 = vmul.f32 %v4536_v12, %v1746_v38  ;;  %v1767_v12 = vld [vmem:[#allocation4 + $0xd0] sm:$0xff] }
 0x330   : > { %1722 = vst.msk [vmem:[#allocation3 + $0x68] sm:$0xff] %vm391_vm1, %v1689_v31  ;;  %2593 = vperm.xlu0 %3278, %v2459_v44   ;;  %2608 = vperm.xlu1 %3277, %v2462_v8   ;;  %v2322_v26 = vadd.f32 %v3221_v3, %v1952_v10  ;;  %v2243_v11 = vpop.f32.mrb[19].mxu1  ;;  %v1745_v31 = vld [vmem:[#allocation4 + $0x20] sm:$0xff]  ;;  %v1939_v8 = vmul.f32 %v4548_v61, %v1747_v49  ;;  %v1750_v3 = vld [vmem:[#allocation4 + $0x48] sm:$0xff] }
 0x331   : > { %2353 = vst.msk [vmem:[#allocation4 + $0x90] sm:$0xff] %vm456_vm0, %v2321_v24  ;;  %v3188_v17 = vpop.f32.mrb[16].mxu0  ;;  %2351 = vst.msk [vmem:[#allocation4 + $0x80] sm:$0xff] %vm456_vm0, %v2319_v28  ;;  %v2320_v34 = vadd.f32 %v2243_v11, %v1950_v2  ;;  %v1671_v5 = vpop.xlane.xlu1 %1670  ;;  %v1937_v22 = vmul.f32 %v4544_v35, %v1745_v31  ;;  %v1751_v35 = vld [vmem:[#allocation4 + $0x50] sm:$0xff]  ;;  %v1749_v61 = vld [vmem:[#allocation4 + $0x40] sm:$0xff] }
 0x332   : > { %v2305_v43 = vadd.f32 %v3188_v17, %v1935_v9  ;;  %v2095_v53 = vpop.f32.mrb[17].mxu0  ;;  %2354 = vst.msk [vmem:[#allocation4 + $0x98] sm:$0xff] %vm456_vm0, %v2322_v26  ;;  %v1705_v27 = vadd.f32 %v1671_v5, %v1609_v63  ;;  %v1941_v26 = vmul.f32 %v4576_v20, %v1749_v61  ;;  %v1944_v17 = vmul.f32 %v4558_v13, %v1752_v30  ;;  %v1765_v63 = vld [vmem:[#allocation4 + $0xc0] sm:$0xff]  ;;  %v4926_v30 = vld [vmem:[#allocation10_spill] sm:$0xff] }
 0x333   : > { %v2303_v55 = vadd.f32 %v2095_v53, %v1933_v48  ;;  %v3189_v18 = vpop.f32.mrb[18].mxu0  ;;  %2352 = vst.msk [vmem:[#allocation4 + $0x88] sm:$0xff] %vm456_vm0, %v2320_v34  ;;  %v2465_v21 = vld [vmem:[#allocation3 + $0xf8] sm:$0xff]  ;;  %v1943_v48 = vmul.f32 %v4568_v33, %v1751_v35  ;;  %v4917_v5 = vld [vmem:[#allocation9_spill] sm:$0xff] }
 0x334   : > { %2337 = vst.msk [vmem:[#allocation4 + $0x10] sm:$0xff] %vm456_vm0, %v2305_v43  ;;  %v2306_v52 = vadd.f32 %v3189_v18, %v1936_v29  ;;  %v2098_v4 = vpop.f32.mrb[19].mxu0  ;;  %2543 = vperm.xlu0 %3278, %v2449_v36   ;;  %2618 = vperm.xlu1 %3277, %v2464_v19   ;;  %v1768_v43 = vld [vmem:[#allocation4 + $0xd8] sm:$0xff]  ;;  %v1942_v53 = vmul.f32 %v4917_v5, %v1750_v3  ;;  %v4918_v18 = vld [vmem:[#allocation7_spill] sm:$0xff] }
 0x335   : > { %1738 = vst.msk [vmem:[#allocation3 + $0xe8] sm:$0xff] %vm391_vm1, %v1705_v27  ;;  %v2304_v1 = vadd.f32 %v2098_v4, %v1934_v46  ;;  %v1959_v36 = vmul.f32 %v4918_v18, %v1767_v12 }
 0x336   : > { %2335 = vst.msk [vmem:[#allocation4] sm:$0xff] %vm456_vm0, %v2303_v55  ;;  %2338 = vst.msk [vmem:[#allocation4 + $0x18] sm:$0xff] %vm456_vm0, %v2306_v52  ;;  %v1766_v55 = vld [vmem:[#allocation4 + $0xc8] sm:$0xff]  ;;  %v4919_v52 = vld [vmem:[#allocation11_spill] sm:$0xff] }
 0x337   : > { %2336 = vst.msk [vmem:[#allocation4 + $0x8] sm:$0xff] %vm456_vm0, %v2304_v1  ;;  %v2447_v58 = vld [vmem:[#allocation3 + $0x68] sm:$0xff]  ;;  %v1957_v20 = vmul.f32 %v4919_v52, %v1765_v63  ;;  %v4920_v1 = vld [vmem:[#allocation5_spill] sm:$0xff]  ;;  %v1958_v7 = vmul.f32 %v4921_v59, %v1766_v55 }
 0x338   : > { %2533 = vperm.xlu0 %3278, %v2447_v58   ;;  %v1960_v58 = vmul.f32 %v4920_v1, %v1768_v43  ;;  %v2420_v55 = vld [vmem:[#allocation4 + $0x90] sm:$0xff]  ;;  %v2418_v59 = vld [vmem:[#allocation4 + $0x80] sm:$0xff] }
 0x33c   : > { %v2463_v50 = vld [vmem:[#allocation3 + $0xe8] sm:$0xff] }
 0x33d   : > { %2613 = vperm.xlu0 %3278, %v2463_v50  }
 0x341   : > { %2623 = vperm.xlu0 %3278, %v2465_v21   ;;  %v3224_v57 = vpop.f32.mrb[20].mxu1 }
 0x342   : > { %v2325_v62 = vadd.f32 %v3224_v57, %v1955_v47  ;;  %v2256_v32 = vpop.f32.mrb[21].mxu1 }
 0x343   : > { %v2323_v37 = vadd.f32 %v2256_v32, %v1953_v23  ;;  %v3225_v16 = vpop.f32.mrb[22].mxu1  ;;  %v1756_v32 = vld [vmem:[#allocation4 + $0x78] sm:$0xff] }
 0x344   : > { %2357 = vst.msk [vmem:[#allocation4 + $0xb0] sm:$0xff] %vm456_vm0, %v2325_v62  ;;  %v2326_v14 = vadd.f32 %v3225_v16, %v1956_v60  ;;  %v2259_v51 = vpop.f32.mrb[23].mxu1  ;;  %v1755_v60 = vld [vmem:[#allocation4 + $0x70] sm:$0xff]  ;;  %v1753_v62 = vld [vmem:[#allocation4 + $0x60] sm:$0xff] }
 0x345   : > { %2355 = vst.msk [vmem:[#allocation4 + $0xa0] sm:$0xff] %vm456_vm0, %v2323_v37  ;;  %v2324_v45 = vadd.f32 %v2259_v51, %v1954_v40  ;;  %v1754_v40 = vld [vmem:[#allocation4 + $0x68] sm:$0xff]  ;;  %v4922_v37 = vld [vmem:[#allocation15_spill] sm:$0xff]  ;;  %v1945_v51 = vmul.f32 %v4595_v0, %v1753_v62  ;;  %v1961_v0 = vmul.f32 %v4599_v25, %v1769_v6 }
 0x346   : > { %2358 = vst.msk [vmem:[#allocation4 + $0xb8] sm:$0xff] %vm456_vm0, %v2326_v14  ;;  %v1947_v16 = vmul.f32 %v4922_v37, %v1755_v60  ;;  %v1771_v14 = vld [vmem:[#allocation4 + $0xf0] sm:$0xff]  ;;  %v2421_v37 = vld [vmem:[#allocation4 + $0x98] sm:$0xff] }
 0x347   : > { %2356 = vst.msk [vmem:[#allocation4 + $0xa8] sm:$0xff] %vm456_vm0, %v2324_v45  ;;  %v4923_v45 = vld [vmem:[#allocation6_spill] sm:$0xff] }
 0x348   : > { %v1948_v31 = vmul.f32 %v4923_v45, %v1756_v32 }
 0x349   : > { %v3192_v42 = vpop.f32.mrb[20].mxu0 }
 0x34a   : > { %v2309_v10 = vadd.f32 %v3192_v42, %v1939_v8  ;;  %v2111_v24 = vpop.f32.mrb[21].mxu0  ;;  %v4924_v42 = vld [vmem:[#allocation13_spill] sm:$0xff] }
 0x34b   : > { %v2307_v44 = vadd.f32 %v2111_v24, %v1937_v22  ;;  %v3193_v56 = vpop.f32.mrb[22].mxu0  ;;  %v1772_v22 = vld [vmem:[#allocation4 + $0xf8] sm:$0xff]  ;;  %v2424_v45 = vld [vmem:[#allocation4 + $0xb0] sm:$0xff] }
 0x34c   : > { %2341 = vst.msk [vmem:[#allocation4 + $0x30] sm:$0xff] %vm456_vm0, %v2309_v10  ;;  %v2310_v9 = vadd.f32 %v3193_v56, %v1940_v15  ;;  %v2114_v2 = vpop.f32.mrb[23].mxu0  ;;  %v1946_v15 = vmul.f32 %v4924_v42, %v1754_v40  ;;  %v1964_v3 = vmul.f32 %v4926_v30, %v1772_v22 }
 0x34d   : > { %2339 = vst.msk [vmem:[#allocation4 + $0x20] sm:$0xff] %vm456_vm0, %v2307_v44  ;;  %v2308_v28 = vadd.f32 %v2114_v2, %v1938_v39  ;;  %v1770_v39 = vld [vmem:[#allocation4 + $0xe8] sm:$0xff] }
 0x34e   : > { %2342 = vst.msk [vmem:[#allocation4 + $0x38] sm:$0xff] %vm456_vm0, %v2310_v9  ;;  %v4925_v44 = vld [vmem:[#allocation14_spill] sm:$0xff] }
 0x34f   : > { %2340 = vst.msk [vmem:[#allocation4 + $0x28] sm:$0xff] %vm456_vm0, %v2308_v28  ;;  %v1963_v56 = vmul.f32 %v4925_v44, %v1771_v14  ;;  %v2419_v44 = vld [vmem:[#allocation4 + $0x88] sm:$0xff] }
 0x353   : > { %v2408_v62 = vld [vmem:[#allocation4 + $0x30] sm:$0xff] }
 0x355   : > { %v3196_v11 = vpop.f32.mrb[24].mxu0  ;;  %v2409_v30 = vld [vmem:[#allocation4 + $0x38] sm:$0xff] }
 0x356   : > { %v2313_v29 = vadd.f32 %v3196_v11, %v1943_v48  ;;  %v2127_v34 = vpop.f32.mrb[25].mxu0 }
 0x357   : > { %v2311_v46 = vadd.f32 %v2127_v34, %v1941_v26  ;;  %v3197_v27 = vpop.f32.mrb[26].mxu0  ;;  %v4927_v26 = vld [vmem:[#allocation18_spill] sm:$0xff] }
 0x358   : > { %2345 = vst.msk [vmem:[#allocation4 + $0x50] sm:$0xff] %vm456_vm0, %v2313_v29  ;;  %v2314_v33 = vadd.f32 %v3197_v27, %v1944_v17  ;;  %v2130_v19 = vpop.f32.mrb[27].mxu0  ;;  %v1962_v11 = vmul.f32 %v4927_v26, %v1770_v39 }
 0x359   : > { %2343 = vst.msk [vmem:[#allocation4 + $0x40] sm:$0xff] %vm456_vm0, %v2311_v46  ;;  %v2312_v13 = vadd.f32 %v2130_v19, %v1942_v53  ;;  %v3228_v4 = vpop.f32.mrb[24].mxu1  ;;  %v2404_v53 = vld [vmem:[#allocation4 + $0x10] sm:$0xff] }
 0x35a   : > { %2346 = vst.msk [vmem:[#allocation4 + $0x58] sm:$0xff] %vm456_vm0, %v2314_v33  ;;  %v2329_v50 = vadd.f32 %v3228_v4, %v1959_v36  ;;  %v2272_v41 = vpop.f32.mrb[25].mxu1  ;;  %v2402_v4 = vld [vmem:[#allocation4] sm:$0xff] }
 0x35b   : > { %2344 = vst.msk [vmem:[#allocation4 + $0x48] sm:$0xff] %vm456_vm0, %v2312_v13  ;;  %v2327_v54 = vadd.f32 %v2272_v41, %v1957_v20  ;;  %v3229_v47 = vpop.f32.mrb[26].mxu1 }
 0x35c   : > { %2361 = vst.msk [vmem:[#allocation4 + $0xd0] sm:$0xff] %vm456_vm0, %v2329_v50  ;;  %v2330_v21 = vadd.f32 %v3229_v47, %v1960_v58  ;;  %v2275_v23 = vpop.f32.mrb[27].mxu1  ;;  %v2405_v47 = vld [vmem:[#allocation4 + $0x18] sm:$0xff] }
 0x35d   : > { %2359 = vst.msk [vmem:[#allocation4 + $0xc0] sm:$0xff] %vm456_vm0, %v2327_v54  ;;  %v2328_v57 = vadd.f32 %v2275_v23, %v1958_v7 }
 0x35e   : > { %2362 = vst.msk [vmem:[#allocation4 + $0xd8] sm:$0xff] %vm456_vm0, %v2330_v21 }
 0x35f   : > { %2360 = vst.msk [vmem:[#allocation4 + $0xc8] sm:$0xff] %vm456_vm0, %v2328_v57 }
 0x369   : > { %v3200_v49 = vpop.f32.mrb[28].mxu0 }
 0x36a   : > { %v2317_v38 = vadd.f32 %v3200_v49, %v1947_v16  ;;  %v2143_v8 = vpop.f32.mrb[29].mxu0 }
 0x36b   : > { %v2315_v10 = vadd.f32 %v2143_v8, %v1945_v51  ;;  %v3201_v24 = vpop.f32.mrb[30].mxu0 }
 0x36c   : > { %2349 = vst.msk [vmem:[#allocation4 + $0x70] sm:$0xff] %vm456_vm0, %v2317_v38  ;;  %v2318_v9 = vadd.f32 %v3201_v24, %v1948_v31  ;;  %v2146_v2 = vpop.f32.mrb[31].mxu0  ;;  %v2403_v38 = vld [vmem:[#allocation4 + $0x8] sm:$0xff] }
 0x36d   : > { %2347 = vst.msk [vmem:[#allocation4 + $0x60] sm:$0xff] %vm456_vm0, %v2315_v10  ;;  %v2316_v28 = vadd.f32 %v2146_v2, %v1946_v15  ;;  %v3232_v35 = vpop.f32.mrb[28].mxu1  ;;  %v2479_v61 = vpop.permute.xlu1 %2478  ;;  %v2406_v10 = vld [vmem:[#allocation4 + $0x20] sm:$0xff] }
 0x36e   : > { %2350 = vst.msk [vmem:[#allocation4 + $0x78] sm:$0xff] %vm456_vm0, %v2318_v9  ;;  %v2333_v48 = vadd.f32 %v3232_v35, %v1963_v56  ;;  %v2288_v12 = vpop.f32.mrb[29].mxu1  ;;  %3455 = vrcp.f32 %v2479_v61 }
 0x36f   : > { %2348 = vst.msk [vmem:[#allocation4 + $0x68] sm:$0xff] %vm456_vm0, %v2316_v28  ;;  %v2331_v17 = vadd.f32 %v2288_v12, %v1961_v0  ;;  %v3233_v63 = vpop.f32.mrb[30].mxu1  ;;  %v2422_v28 = vld [vmem:[#allocation4 + $0xa0] sm:$0xff] }
 0x370   : > { %2365 = vst.msk [vmem:[#allocation4 + $0xf0] sm:$0xff] %vm456_vm0, %v2333_v48  ;;  %v2334_v25 = vadd.f32 %v3233_v63, %v1964_v3  ;;  %v2291_v29 = vpop.f32.mrb[31].mxu1 }
 0x371   : > { %2363 = vst.msk [vmem:[#allocation4 + $0xe0] sm:$0xff] %vm456_vm0, %v2331_v17  ;;  %v2332_v34 = vadd.f32 %v2291_v29, %v1962_v11  ;;  %v2559_v43 = vpop.permute.xlu1 %2558  ;;  %v2412_v11 = vld [vmem:[#allocation4 + $0x50] sm:$0xff] }
 0x372   : > { %2366 = vst.msk [vmem:[#allocation4 + $0xf8] sm:$0xff] %vm456_vm0, %v2334_v25  ;;  %3457 = vrcp.f32 %v2559_v43  ;;  %v2425_v25 = vld [vmem:[#allocation4 + $0xb8] sm:$0xff] }
 0x373   : > { %2364 = vst.msk [vmem:[#allocation4 + $0xe8] sm:$0xff] %vm456_vm0, %v2332_v34 }
 0x378   : > { %v3456_v5 = vpop.eup %3455 }
 0x379   : > { %v2631_v46 = vmul.f32 %v3456_v5, %v2404_v53  ;;  %v2428_v53 = vld [vmem:[#allocation4 + $0xd0] sm:$0xff] }
 0x37b   : > { %2692 = vst.msk [vmem:[%s4726_s10 + $0x10] sm:$0xff] %vm456_vm0, %v2631_v46 }
 0x37c   : > { %v3458_v27 = vpop.eup %3457 }
 0x37d   : > { %v2663_v18 = vmul.f32 %v3458_v27, %v2420_v55  ;;  %v2407_v55 = vld [vmem:[#allocation4 + $0x28] sm:$0xff] }
 0x37f   : > { %2708 = vst.msk [vmem:[%s4726_s10 + $0x90] sm:$0xff] %vm456_vm0, %v2663_v18  ;;  %v2469_v36 = vpop.permute.xlu1 %2468 }
 0x380   : > { %3459 = vrcp.f32 %v2469_v36 }
 0x383   : > { %v2549_v33 = vpop.permute.xlu1 %2548  ;;  %v2484_v19 = vpop.permute.xlu0 %2483 }
 0x384   : > { %3461 = vrcp.f32 %v2549_v33 }
 0x385   : > { %3463 = vrcp.f32 %v2484_v19 }
 0x387   : > { %v2499_v52 = vpop.permute.xlu1 %2498  ;;  %v2564_v20 = vpop.permute.xlu0 %2563 }
 0x388   : > { %3465 = vrcp.f32 %v2499_v52  ;;  %v2410_v52 = vld [vmem:[#allocation4 + $0x40] sm:$0xff] }
 0x389   : > { %3467 = vrcp.f32 %v2564_v20 }
 0x38a   : > { %v3460_v13 = vpop.eup %3459 }
 0x38b   : > { %v2627_v1 = vmul.f32 %v3460_v13, %v2402_v4  ;;  %v2579_v58 = vpop.permute.xlu1 %2578  ;;  %v2474_v50 = vpop.permute.xlu0 %2473  ;;  %v2423_v4 = vld [vmem:[#allocation4 + $0xa8] sm:$0xff] }
 0x38c   : > { %3469 = vrcp.f32 %v2579_v58 }
 0x38d   : > { %2690 = vst.msk [vmem:[%s4726_s10] sm:$0xff] %vm456_vm0, %v2627_v1  ;;  %3471 = vrcp.f32 %v2474_v50 }
 0x38e   : > { %v3462_v41 = vpop.eup %3461 }
 0x38f   : > { %v3464_v7 = vpop.eup %3463  ;;  %v2659_v54 = vmul.f32 %v3462_v41, %v2418_v59  ;;  %v2489_v21 = vpop.permute.xlu1 %2488  ;;  %v2426_v59 = vld [vmem:[#allocation4 + $0xc0] sm:$0xff] }
 0x390   : > { %v2554_v23 = vpop.permute.xlu0 %2553  ;;  %v2633_v57 = vmul.f32 %v3464_v7, %v2405_v47  ;;  %3473 = vrcp.f32 %v2489_v21  ;;  %v2413_v47 = vld [vmem:[#allocation4 + $0x58] sm:$0xff] }
 0x391   : > { %2706 = vst.msk [vmem:[%s4726_s10 + $0x80] sm:$0xff] %vm456_vm0, %v2659_v54  ;;  %3475 = vrcp.f32 %v2554_v23 }
 0x392   : > { %v3466_v60 = vpop.eup %3465  ;;  %2693 = vst.msk [vmem:[%s4726_s10 + $0x18] sm:$0xff] %vm456_vm0, %v2633_v57 }
 0x393   : > { %v3468_v32 = vpop.eup %3467  ;;  %v2639_v40 = vmul.f32 %v3466_v60, %v2408_v62  ;;  %v2569_v16 = vpop.permute.xlu1 %2568  ;;  %v2416_v62 = vld [vmem:[#allocation4 + $0x70] sm:$0xff] }
 0x394   : > { %v2504_v14 = vpop.permute.xlu0 %2503  ;;  %v2665_v51 = vmul.f32 %v3468_v32, %v2421_v37  ;;  %3477 = vrcp.f32 %v2569_v16  ;;  %v2429_v37 = vld [vmem:[#allocation4 + $0xd8] sm:$0xff] }
 0x395   : > { %2696 = vst.msk [vmem:[%s4726_s10 + $0x30] sm:$0xff] %vm456_vm0, %v2639_v40  ;;  %3479 = vrcp.f32 %v2504_v14 }
 0x396   : > { %v3470_v49 = vpop.eup %3469  ;;  %2709 = vst.msk [vmem:[%s4726_s10 + $0x98] sm:$0xff] %vm456_vm0, %v2665_v51 }
 0x397   : > { %v3472_v31 = vpop.eup %3471  ;;  %v2671_v6 = vmul.f32 %v3470_v49, %v2424_v45  ;;  %v2519_v8 = vpop.permute.xlu1 %2518  ;;  %v2414_v45 = vld [vmem:[#allocation4 + $0x60] sm:$0xff] }
 0x398   : > { %v2584_v22 = vpop.permute.xlu0 %2583  ;;  %v2629_v42 = vmul.f32 %v3472_v31, %v2403_v38  ;;  %3481 = vrcp.f32 %v2519_v8  ;;  %v2411_v38 = vld [vmem:[#allocation4 + $0x48] sm:$0xff] }
 0x399   : > { %2712 = vst.msk [vmem:[%s4726_s10 + $0xb0] sm:$0xff] %vm456_vm0, %v2671_v6  ;;  %3483 = vrcp.f32 %v2584_v22 }
 0x39a   : > { %v3474_v15 = vpop.eup %3473  ;;  %2691 = vst.msk [vmem:[%s4726_s10 + $0x8] sm:$0xff] %vm456_vm0, %v2629_v42 }
 0x39b   : > { %v3476_v24 = vpop.eup %3475  ;;  %v2635_v39 = vmul.f32 %v3474_v15, %v2406_v10  ;;  %v2599_v56 = vpop.permute.xlu1 %2598  ;;  %v2430_v15 = vld [vmem:[#allocation4 + $0xe0] sm:$0xff] }
 0x39c   : > { %v2494_v9 = vpop.permute.xlu0 %2493  ;;  %v2661_v2 = vmul.f32 %v3476_v24, %v2419_v44  ;;  %3485 = vrcp.f32 %v2599_v56 }
 0x39d   : > { %2694 = vst.msk [vmem:[%s4726_s10 + $0x20] sm:$0xff] %vm456_vm0, %v2635_v39  ;;  %3487 = vrcp.f32 %v2494_v9  ;;  %v2427_v39 = vld [vmem:[#allocation4 + $0xc8] sm:$0xff] }
 0x39e   : > { %v3478_v0 = vpop.eup %3477  ;;  %2707 = vst.msk [vmem:[%s4726_s10 + $0x88] sm:$0xff] %vm456_vm0, %v2661_v2  ;;  %v2432_v2 = vld [vmem:[#allocation4 + $0xf0] sm:$0xff] }
 0x39f   : > { %v3480_v35 = vpop.eup %3479  ;;  %v2667_v61 = vmul.f32 %v3478_v0, %v2422_v28  ;;  %v2509_v3 = vpop.permute.xlu1 %2508 }
 0x3a0   : > { %v2574_v48 = vpop.permute.xlu0 %2573  ;;  %v2641_v12 = vmul.f32 %v3480_v35, %v2409_v30  ;;  %3489 = vrcp.f32 %v2509_v3  ;;  %v2417_v35 = vld [vmem:[#allocation4 + $0x78] sm:$0xff] }
 0x3a1   : > { %2710 = vst.msk [vmem:[%s4726_s10 + $0xa0] sm:$0xff] %vm456_vm0, %v2667_v61  ;;  %3491 = vrcp.f32 %v2574_v48  ;;  %v2415_v48 = vld [vmem:[#allocation4 + $0x68] sm:$0xff] }
 0x3a2   : > { %v3482_v26 = vpop.eup %3481  ;;  %2697 = vst.msk [vmem:[%s4726_s10 + $0x38] sm:$0xff] %vm456_vm0, %v2641_v12 }
 0x3a3   : > { %v3484_v17 = vpop.eup %3483  ;;  %v2647_v63 = vmul.f32 %v3482_v26, %v2412_v11  ;;  %v2589_v29 = vpop.permute.xlu1 %2588  ;;  %v2431_v11 = vld [vmem:[#allocation4 + $0xe8] sm:$0xff] }
 0x3a4   : > { %v2524_v34 = vpop.permute.xlu0 %2523  ;;  %v2673_v43 = vmul.f32 %v3484_v17, %v2425_v25  ;;  %3493 = vrcp.f32 %v2589_v29  ;;  %v2433_v25 = vld [vmem:[#allocation4 + $0xf8] sm:$0xff] }
 0x3a5   : > { %2700 = vst.msk [vmem:[%s4726_s10 + $0x50] sm:$0xff] %vm456_vm0, %v2647_v63  ;;  %3495 = vrcp.f32 %v2524_v34 }
 0x3a6   : > { %v3486_v5 = vpop.eup %3485  ;;  %2713 = vst.msk [vmem:[%s4726_s10 + $0xb8] sm:$0xff] %vm456_vm0, %v2673_v43 }
 0x3a7   : > { %v3488_v46 = vpop.eup %3487  ;;  %v2679_v27 = vmul.f32 %v3486_v5, %v2428_v53  ;;  %v2539_v18 = vpop.permute.xlu1 %2538 }
 0x3a8   : > { %v2604_v36 = vpop.permute.xlu0 %2603  ;;  %v2637_v33 = vmul.f32 %v3488_v46, %v2407_v55  ;;  %3497 = vrcp.f32 %v2539_v18 }
 0x3a9   : > { %2716 = vst.msk [vmem:[%s4726_s10 + $0xd0] sm:$0xff] %vm456_vm0, %v2679_v27  ;;  %3499 = vrcp.f32 %v2604_v36 }
 0x3aa   : > { %v3490_v19 = vpop.eup %3489  ;;  %2695 = vst.msk [vmem:[%s4726_s10 + $0x28] sm:$0xff] %vm456_vm0, %v2637_v33 }
 0x3ab   : > { %v3492_v20 = vpop.eup %3491  ;;  %v2643_v13 = vmul.f32 %v3490_v19, %v2410_v52  ;;  %v2529_v1 = vpop.permute.xlu1 %2528 }
 0x3ac   : > { %v2514_v58 = vpop.permute.xlu0 %2513  ;;  %v2669_v50 = vmul.f32 %v3492_v20, %v2423_v4  ;;  %3501 = vrcp.f32 %v2529_v1 }
 0x3ad   : > { %2698 = vst.msk [vmem:[%s4726_s10 + $0x40] sm:$0xff] %vm456_vm0, %v2643_v13  ;;  %3503 = vrcp.f32 %v2514_v58 }
 0x3ae   : > { %v3494_v41 = vpop.eup %3493  ;;  %2711 = vst.msk [vmem:[%s4726_s10 + $0xa8] sm:$0xff] %vm456_vm0, %v2669_v50 }
 0x3af   : > { %v3496_v7 = vpop.eup %3495  ;;  %v2675_v54 = vmul.f32 %v3494_v41, %v2426_v59  ;;  %v2609_v21 = vpop.permute.xlu1 %2608 }
 0x3b0   : > { %v2594_v23 = vpop.permute.xlu0 %2593  ;;  %v2649_v57 = vmul.f32 %v3496_v7, %v2413_v47  ;;  %3505 = vrcp.f32 %v2609_v21 }
 0x3b1   : > { %2714 = vst.msk [vmem:[%s4726_s10 + $0xc0] sm:$0xff] %vm456_vm0, %v2675_v54  ;;  %3507 = vrcp.f32 %v2594_v23 }
 0x3b2   : > { %v3498_v60 = vpop.eup %3497  ;;  %2701 = vst.msk [vmem:[%s4726_s10 + $0x58] sm:$0xff] %vm456_vm0, %v2649_v57 }
 0x3b3   : > { %v3500_v32 = vpop.eup %3499  ;;  %v2655_v40 = vmul.f32 %v3498_v60, %v2416_v62  ;;  %v2619_v16 = vpop.permute.xlu1 %2618 }
 0x3b4   : > { %v2544_v14 = vpop.permute.xlu0 %2543  ;;  %v2681_v51 = vmul.f32 %v3500_v32, %v2429_v37  ;;  %3509 = vrcp.f32 %v2619_v16 }
 0x3b5   : > { %2704 = vst.msk [vmem:[%s4726_s10 + $0x70] sm:$0xff] %vm456_vm0, %v2655_v40  ;;  %3511 = vrcp.f32 %v2544_v14 }
 0x3b6   : > { %v3502_v49 = vpop.eup %3501  ;;  %2717 = vst.msk [vmem:[%s4726_s10 + $0xd8] sm:$0xff] %vm456_vm0, %v2681_v51 }
 0x3b7   : > { %v3504_v31 = vpop.eup %3503  ;;  %v2651_v6 = vmul.f32 %v3502_v49, %v2414_v45 }
 0x3b8   : > { %v2534_v8 = vpop.permute.xlu0 %2533  ;;  %v2645_v22 = vmul.f32 %v3504_v31, %v2411_v38 }
 0x3b9   : > { %3513 = vrcp.f32 %v2534_v8  ;;  %2702 = vst.msk [vmem:[%s4726_s10 + $0x60] sm:$0xff] %vm456_vm0, %v2651_v6 }
 0x3ba   : > { %v3506_v42 = vpop.eup %3505  ;;  %2699 = vst.msk [vmem:[%s4726_s10 + $0x48] sm:$0xff] %vm456_vm0, %v2645_v22 }
 0x3bb   : > { %v3508_v10 = vpop.eup %3507  ;;  %v2683_v24 = vmul.f32 %v3506_v42, %v2430_v15 }
 0x3bc   : > { %v2677_v44 = vmul.f32 %v3508_v10, %v2427_v39  ;;  %v2614_v56 = vpop.permute.xlu0 %2613 }
 0x3bd   : > { %2718 = vst.msk [vmem:[%s4726_s10 + $0xe0] sm:$0xff] %vm456_vm0, %v2683_v24  ;;  %3515 = vrcp.f32 %v2614_v56 }
 0x3be   : > { %v3510_v9 = vpop.eup %3509  ;;  %2715 = vst.msk [vmem:[%s4726_s10 + $0xc8] sm:$0xff] %vm456_vm0, %v2677_v44 }
 0x3bf   : > { %v3512_v0 = vpop.eup %3511  ;;  %v2687_v28 = vmul.f32 %v3510_v9, %v2432_v2 }
 0x3c0   : > { %v2657_v61 = vmul.f32 %v3512_v0, %v2417_v35  ;;  %v2624_v30 = vpop.permute.xlu0 %2623 }
 0x3c1   : > { %2720 = vst.msk [vmem:[%s4726_s10 + $0xf0] sm:$0xff] %vm456_vm0, %v2687_v28  ;;  %3517 = vrcp.f32 %v2624_v30 }
 0x3c2   : > { %2705 = vst.msk [vmem:[%s4726_s10 + $0x78] sm:$0xff] %vm456_vm0, %v2657_v61 }
 0x3c3   : > { %v3514_v3 = vpop.eup %3513 }
 0x3c4   : > { %v2653_v12 = vmul.f32 %v3514_v3, %v2415_v48 }
 0x3c6   : > { %2703 = vst.msk [vmem:[%s4726_s10 + $0x68] sm:$0xff] %vm456_vm0, %v2653_v12 }
 0x3c7   : > { %v3516_v26 = vpop.eup %3515 }
 0x3c8   : > { %v2685_v17 = vmul.f32 %v3516_v26, %v2431_v11 }
 0x3ca   : > { %2719 = vst.msk [vmem:[%s4726_s10 + $0xe8] sm:$0xff] %vm456_vm0, %v2685_v17 }
 0x3cb   : > { %v3518_v63 = vpop.eup %3517 }
 0x3cc   : > { %v2689_v29 = vmul.f32 %v3518_v63, %v2433_v25 }
 0x3ce   : > { %2721 = vst.msk [vmem:[%s4726_s10 + $0xf8] sm:$0xff] %vm456_vm0, %v2689_v29 }
 0x3cf PF: > { %s14_s17 = sadd.s32 1, %s3541_s17   ;;  %s4928_s15 = smov %s3537_s16 }
 0x3d0   : > { %p11_p5 = scmp.ge.s32.totalorder %s14_s17, 4   ;;  %s4929_s16 = smov %s4931_s18 }
 0x3d2   :  { %13 = sbr.rel (!%p11_p5) target bundleno = 2 (0x2), region = 83 }

</bundles_post_ra>
